<compile_context>
chip_gen: v6e
topology: v6e:2x2x1
jax: 0.10.0
libtpu: 0.0.40
codegen_flags: <defaults>
</compile_context>

<pallas_src>
import functools
import jax
import jax.numpy as jnp
from jax.experimental import pallas as pl
from jax.experimental.pallas import tpu as pltpu

# ---------------- small ESM2-like config (lane-dense: last dims multiples of 128) ----
VOCAB = 33
HIDDEN = 128            # stand-in for 1280
N_HEADS = 4
HEAD_DIM = HIDDEN // N_HEADS
FFN = 256               # stand-in for 5120
N_LAYERS = 2
LN_EPS = 1e-5
MASK_TOKEN_ID = 32
PAD_TOKEN_ID = 1
ANTIGEN_DIM = 128       # stand-in for 640
CLS_HIDDEN = 128        # stand-in for 768
NEG_BIAS = -1e9         # finite masking constant (avoids inf-inf -> NaN)


# ---------------- in-kernel helpers (pure jnp on values) ----------------
def _ln(x, g, b):
    mu = jnp.mean(x, axis=-1, keepdims=True)
    var = jnp.mean(jnp.square(x - mu), axis=-1, keepdims=True)
    return (x - mu) * jax.lax.rsqrt(var + LN_EPS) * g + b


def _erf(x):
    # Abramowitz & Stegun 7.1.26 polynomial (|err| < 1.5e-7): keeps ESM's exact-erf
    # GELU semantics using only VPU/EUP primitives that are guaranteed to lower.
    a1, a2, a3, a4, a5 = 0.254829592, -0.284496736, 1.421413741, -1.453152027, 1.061405429
    p = 0.3275911
    s = jnp.where(x >= 0.0, 1.0, -1.0)
    ax = jnp.abs(x)
    t = 1.0 / (1.0 + p * ax)
    poly = ((((a5 * t + a4) * t + a3) * t + a2) * t + a1) * t
    return s * (1.0 - poly * jnp.exp(-ax * ax))


def _gelu_erf(x):
    return 0.5 * x * (1.0 + _erf(x * 0.7071067811865476))


def _rope(x, cos, sin):
    d = x.shape[-1]
    x1 = x[:, : d // 2]
    x2 = x[:, d // 2:]
    return x * cos + jnp.concatenate([-x2, x1], axis=-1) * sin


# ---------------- fused encoder kernel: all layers, one pallas_call ----------------
def _encoder_kernel(emb_ref, bias_ref, cos_ref, sin_ref, pool_ref,
                    ln1g_ref, ln1b_ref, wqkv_ref, bqkv_ref, wo_ref, bo_ref,
                    ln2g_ref, ln2b_ref, wi_ref, bi_ref, wo2_ref, bo2_ref,
                    flng_ref, flnb_ref,
                    out_ref, h_scr):
    layer = pl.program_id(0)

    @pl.when(layer == 0)
    def _():
        h_scr[...] = emb_ref[...]                    # load embeddings once

    h = h_scr[...]                                   # (M, H) resident in VMEM
    cos = cos_ref[...]                               # (M, D)
    sin = sin_ref[...]
    bias = bias_ref[...]                             # (M, M) block-diag + key-pad mask

    # ---- attention sub-block (pre-LN, fused QKV matmul) ----
    ln1 = _ln(h, ln1g_ref[0], ln1b_ref[0])
    qkv = jnp.dot(ln1, wqkv_ref[0], preferred_element_type=jnp.float32) + bqkv_ref[0]

    scale = HEAD_DIM ** -0.5
    ctx_heads = []
    for hh in range(N_HEADS):
        q = qkv[:, hh * HEAD_DIM:(hh + 1) * HEAD_DIM]
        k = qkv[:, HIDDEN + hh * HEAD_DIM:HIDDEN + (hh + 1) * HEAD_DIM]
        v = qkv[:, 2 * HIDDEN + hh * HEAD_DIM:2 * HIDDEN + (hh + 1) * HEAD_DIM]
        q = _rope(q, cos, sin) * scale
        k = _rope(k, cos, sin)
        s = jnp.dot(q, k.T, preferred_element_type=jnp.float32) + bias      # (M, M)
        m = jnp.max(s, axis=-1, keepdims=True)
        p = jnp.exp(s - m)
        p = p * pl.reciprocal(jnp.sum(p, axis=-1, keepdims=True), approx=True)
        ctx_heads.append(jnp.dot(p, v, preferred_element_type=jnp.float32))
    ctx = jnp.concatenate(ctx_heads, axis=-1)                               # (M, H)

    attn_out = jnp.dot(ctx, wo_ref[0], preferred_element_type=jnp.float32) + bo_ref[0] + h

    # ---- FFN sub-block (pre-LN, erf-GELU), residual ----
    ln2 = _ln(attn_out, ln2g_ref[0], ln2b_ref[0])
    inter = _gelu_erf(jnp.dot(ln2, wi_ref[0], preferred_element_type=jnp.float32) + bi_ref[0])
    h_new = jnp.dot(inter, wo2_ref[0], preferred_element_type=jnp.float32) + bo2_ref[0] + attn_out
    h_scr[...] = h_new

    # ---- last layer: final layernorm + masked-mean pooling (normalized pool matmul) ----
    @pl.when(layer == pl.num_programs(0) - 1)
    def _():
        hf = _ln(h_new, flng_ref[...], flnb_ref[...])
        out_ref[...] = jnp.dot(pool_ref[...], hf, preferred_element_type=jnp.float32)


def esm_encode(params, input_ids, attention_mask):
    B, S = input_ids.shape
    M = B * S
    mask_f = attention_mask.astype(jnp.float32)

    # --- embeddings with ESM token-dropout rescaling (gather + scalar glue) ---
    emb = params["word_emb"][input_ids]                                # (B, S, H)
    is_mask_tok = (input_ids == MASK_TOKEN_ID)
    emb = jnp.where(is_mask_tok[:, :, None], 0.0, emb)
    mask_ratio_train = 0.15 * 0.8
    src_len = jnp.maximum(jnp.sum(mask_f, axis=-1), 1.0)
    mask_ratio_obs = jnp.sum(is_mask_tok.astype(jnp.float32), axis=-1) / src_len
    scale = (1.0 - mask_ratio_train) / jnp.maximum(1.0 - mask_ratio_obs, 1e-3)
    emb = emb * scale[:, None, None]
    emb = emb * mask_f[:, :, None]
    emb2d = emb.reshape(M, HIDDEN)

    # --- additive attention bias: attend only within same batch row AND to valid keys ---
    batch_idx = jnp.repeat(jnp.arange(B), S)                           # (M,)
    same_batch = (batch_idx[:, None] == batch_idx[None, :]).astype(jnp.float32)
    key_valid = mask_f.reshape(M)[None, :]                             # (1, M)
    bias = (1.0 - same_batch * key_valid) * NEG_BIAS                   # (M, M)

    # --- rotary tables, tiled to flattened rows (row = b*S + s) ---
    inv_freq = 1.0 / (10000.0 ** (jnp.arange(0, HEAD_DIM, 2, dtype=jnp.float32) / HEAD_DIM))
    freqs = jnp.outer(jnp.arange(S, dtype=jnp.float32), inv_freq)      # (S, D/2)
    ang = jnp.concatenate([freqs, freqs], axis=-1)                     # (S, D)
    cos = jnp.tile(jnp.cos(ang), (B, 1))                               # (M, D)
    sin = jnp.tile(jnp.sin(ang), (B, 1))

    # --- masked-mean pooling matrix with normalization folded in (0/0 guarded) ---
    sel = (jnp.arange(B)[:, None] == batch_idx[None, :]).astype(jnp.float32)   # (B, M)
    cnt = jnp.maximum(jnp.sum(mask_f, axis=-1, keepdims=True), 1.0)            # (B, 1)
    pool = sel * mask_f.reshape(M)[None, :] / cnt                              # (B, M)

    def const_spec(shape):
        zeros = (0,) * len(shape)
        return pl.BlockSpec(tuple(shape), lambda l, z=zeros: z)

    def layer_spec(shape):
        tail = (0,) * (len(shape) - 1)
        return pl.BlockSpec((1,) + tuple(shape[1:]), lambda l, t=tail: (l,) + t)

    lw = params["layers"]
    layer_keys = ("ln1_g", "ln1_b", "w_qkv", "b_qkv", "w_o", "b_o",
                  "ln2_g", "ln2_b", "w_i", "b_i", "w_o2", "b_o2")
    args = (emb2d, bias, cos, sin, pool) + tuple(lw[k] for k in layer_keys) + (
        params["final_ln_g"], params["final_ln_b"])
    in_specs = ([const_spec(emb2d.shape), const_spec(bias.shape), const_spec(cos.shape),
                 const_spec(sin.shape), const_spec(pool.shape)]
                + [layer_spec(lw[k].shape) for k in layer_keys]
                + [const_spec(params["final_ln_g"].shape),
                   const_spec(params["final_ln_b"].shape)])

    pooled = pl.pallas_call(
        _encoder_kernel,
        out_shape=jax.ShapeDtypeStruct((B, HIDDEN), jnp.float32),
        grid_spec=pltpu.PrefetchScalarGridSpec(
            num_scalar_prefetch=0,
            grid=(N_LAYERS,),
            in_specs=in_specs,
            out_specs=pl.BlockSpec((B, HIDDEN), lambda l: (0, 0)),
            scratch_shapes=[pltpu.VMEM((M, HIDDEN), jnp.float32)],
        ),
        compiler_params=pltpu.CompilerParams(dimension_semantics=("arbitrary",)),
    )(*args)
    return pooled


# ---------------- fused classification head: dense -> tanh -> out_proj ----------------
def _classifier_kernel(x_ref, w1_ref, b1_ref, w2_ref, b2_ref, o_ref):
    # dropout is an inference-time no-op
    hcls = jnp.tanh(jnp.dot(x_ref[...], w1_ref[...], preferred_element_type=jnp.float32)
                    + b1_ref[...])
    o_ref[...] = jnp.dot(hcls, w2_ref[...], preferred_element_type=jnp.float32) + b2_ref[...]


def classifier_head(params, feats):
    B, FIN = feats.shape
    c = params["cls"]
    logits = pl.pallas_call(
        _classifier_kernel,
        out_shape=jax.ShapeDtypeStruct((B, 1), jnp.float32),
        in_specs=[
            pl.BlockSpec((B, FIN), lambda: (0, 0)),
            pl.BlockSpec((FIN, CLS_HIDDEN), lambda: (0, 0)),
            pl.BlockSpec((1, CLS_HIDDEN), lambda: (0, 0)),
            pl.BlockSpec((CLS_HIDDEN, 1), lambda: (0, 0)),
            pl.BlockSpec((1, 1), lambda: (0, 0)),
        ],
        out_specs=pl.BlockSpec((B, 1), lambda: (0, 0)),
    )(feats, c["w1"], c["b1"].reshape(1, CLS_HIDDEN), c["w2"], c["b2"].reshape(1, 1))
    return logits[:, 0]


# ---------------- full PalmForBindingPrediction forward ----------------
def palm_forward(params, input_ids, attention_mask, antigen_embeddings, labels):
    vhh = esm_encode(params, input_ids, attention_mask)                 # (B, HIDDEN)
    feats = jnp.concatenate([vhh, antigen_embeddings], axis=1)          # (B, HIDDEN+ANTIGEN)
    logits = classifier_head(params, feats)                             # (B,)
    y = labels.astype(jnp.float32)
    # BCEWithLogitsLoss, mean reduction, numerically stable (glue on B scalars)
    loss = jnp.mean(jnp.maximum(logits, 0.0) - logits * y
                    + jnp.log1p(jnp.exp(-jnp.abs(logits))))
    return {"logits": logits, "loss": loss}


# ---------------- deterministic synthetic parameters ----------------
def init_params(key):
    def normal(k, shape):
        return (jax.random.normal(k, shape, jnp.float32) * 0.02).astype(jnp.float32)

    ks = iter(jax.random.split(key, 16))
    L, H, F = N_LAYERS, HIDDEN, FFN
    return {
        "word_emb": normal(next(ks), (VOCAB, H)),
        "layers": {
            "ln1_g": jnp.ones((L, 1, H), jnp.float32),
            "ln1_b": jnp.zeros((L, 1, H), jnp.float32),
            "w_qkv": normal(next(ks), (L, H, 3 * H)),
            "b_qkv": jnp.zeros((L, 1, 3 * H), jnp.float32),
            "w_o": normal(next(ks), (L, H, H)),
            "b_o": jnp.zeros((L, 1, H), jnp.float32),
            "ln2_g": jnp.ones((L, 1, H), jnp.float32),
            "ln2_b": jnp.zeros((L, 1, H), jnp.float32),
            "w_i": normal(next(ks), (L, H, F)),
            "b_i": jnp.zeros((L, 1, F), jnp.float32),
            "w_o2": normal(next(ks), (L, F, H)),
            "b_o2": jnp.zeros((L, 1, H), jnp.float32),
        },
        "final_ln_g": jnp.ones((1, H), jnp.float32),
        "final_ln_b": jnp.zeros((1, H), jnp.float32),
        "cls": {
            "w1": normal(next(ks), (H + ANTIGEN_DIM, CLS_HIDDEN)),
            "b1": jnp.zeros((CLS_HIDDEN,), jnp.float32),
            "w2": normal(next(ks), (CLS_HIDDEN, 1)),
            "b2": jnp.zeros((1,), jnp.float32),
        },
    }


if __name__ == "__main__":
    key = jax.random.PRNGKey(0)
    pkey, ikey, akey = jax.random.split(key, 3)
    params = init_params(pkey)

    B, S = 2, 8
    input_ids = jax.random.randint(ikey, (B, S), 4, 24, dtype=jnp.int32)
    attention_mask = jnp.array([[1] * 8, [1] * 6 + [0] * 2], dtype=jnp.int32)
    input_ids = jnp.where(attention_mask == 0, PAD_TOKEN_ID, input_ids)
    antigen_embeddings = jax.random.normal(akey, (B, ANTIGEN_DIM), jnp.float32)
    labels = jnp.array([1, 0], dtype=jnp.int32)

    fwd = jax.jit(functools.partial(palm_forward, params))
    out = fwd(input_ids, attention_mask, antigen_embeddings, labels)
    jax.block_until_ready(out)

    assert out["logits"].shape == (B,), out["logits"].shape
    assert bool(jnp.all(jnp.isfinite(out["logits"])))
    assert bool(jnp.isfinite(out["loss"]))
    print("KERNEL_OK")
</pallas_src>

<mosaic_0001>
module attributes {stable_mosaic.version = 11 : i64} {
  func.func @_classifier_kernel(%arg0: memref<2x256xf32, #tpu.memory_space<vmem>>, %arg1: memref<256x128xf32, #tpu.memory_space<vmem>>, %arg2: memref<1x128xf32, #tpu.memory_space<vmem>>, %arg3: memref<128x1xf32, #tpu.memory_space<vmem>>, %arg4: memref<1x1xf32, #tpu.memory_space<vmem>>, %arg5: memref<2x1xf32, #tpu.memory_space<vmem>>) attributes {dimension_semantics = [], scalar_prefetch = 0 : i64, scratch_operands = 0 : i64, tpu.core_type = #tpu.core_type<tc>} {
    %c0 = arith.constant 0 : index
    %c0_0 = arith.constant 0 : index
    %0 = vector.load %arg0[%c0, %c0_0] : memref<2x256xf32, #tpu.memory_space<vmem>>, vector<2x256xf32>
    %c0_1 = arith.constant 0 : index
    %c0_2 = arith.constant 0 : index
    %1 = vector.load %arg1[%c0_1, %c0_2] : memref<256x128xf32, #tpu.memory_space<vmem>>, vector<256x128xf32>
    %cst = arith.constant dense<0.000000e+00> : vector<2x128xf32>
    %2 = tpu.matmul %0, %1, %cst {dimension_numbers = #tpu.dot_dimension_numbers<[1], [0], [0], [1], [0, 0, 1, 1], [], []>} : vector<2x256xf32>, vector<256x128xf32>, vector<2x128xf32> -> vector<2x128xf32>
    %c0_3 = arith.constant 0 : index
    %c0_4 = arith.constant 0 : index
    %3 = vector.load %arg2[%c0_3, %c0_4] : memref<1x128xf32, #tpu.memory_space<vmem>>, vector<1x128xf32>
    %4 = vector.broadcast %3 : vector<1x128xf32> to vector<2x128xf32>
    %5 = arith.addf %2, %4 : vector<2x128xf32>
    %6 = math.tanh %5 : vector<2x128xf32>
    %c0_5 = arith.constant 0 : index
    %c0_6 = arith.constant 0 : index
    %7 = vector.load %arg3[%c0_5, %c0_6] : memref<128x1xf32, #tpu.memory_space<vmem>>, vector<128x1xf32>
    %cst_7 = arith.constant dense<0.000000e+00> : vector<2x1xf32>
    %8 = tpu.matmul %6, %7, %cst_7 {dimension_numbers = #tpu.dot_dimension_numbers<[1], [0], [0], [1], [0, 0, 1, 1], [], []>} : vector<2x128xf32>, vector<128x1xf32>, vector<2x1xf32> -> vector<2x1xf32>
    %c0_8 = arith.constant 0 : index
    %c0_9 = arith.constant 0 : index
    %9 = vector.load %arg4[%c0_8, %c0_9] : memref<1x1xf32, #tpu.memory_space<vmem>>, vector<1x1xf32>
    %10 = vector.broadcast %9 : vector<1x1xf32> to vector<2x1xf32>
    %11 = arith.addf %8, %10 : vector<2x1xf32>
    %c0_10 = arith.constant 0 : index
    %c0_11 = arith.constant 0 : index
    %12 = vector.load %arg5[%c0_10, %c0_11] : memref<2x1xf32, #tpu.memory_space<vmem>>, vector<2x1xf32>
    tpu.vector_store %arg5[%c0_10, %c0_11], %11 {strides = array<i32>} : memref<2x1xf32, #tpu.memory_space<vmem>>, vector<2x1xf32>,
    return
  }
}

module attributes {stable_mosaic.version = 11 : i64} {
  func.func @_encoder_kernel(%arg0: i32, %arg1: memref<16x128xf32, #tpu.memory_space<vmem>>, %arg2: memref<16x16xf32, #tpu.memory_space<vmem>>, %arg3: memref<16x32xf32, #tpu.memory_space<vmem>>, %arg4: memref<16x32xf32, #tpu.memory_space<vmem>>, %arg5: memref<2x16xf32, #tpu.memory_space<vmem>>, %arg6: memref<1x1x128xf32, #tpu.memory_space<vmem>>, %arg7: memref<1x1x128xf32, #tpu.memory_space<vmem>>, %arg8: memref<1x128x384xf32, #tpu.memory_space<vmem>>, %arg9: memref<1x1x384xf32, #tpu.memory_space<vmem>>, %arg10: memref<1x128x128xf32, #tpu.memory_space<vmem>>, %arg11: memref<1x1x128xf32, #tpu.memory_space<vmem>>, %arg12: memref<1x1x128xf32, #tpu.memory_space<vmem>>, %arg13: memref<1x1x128xf32, #tpu.memory_space<vmem>>, %arg14: memref<1x128x256xf32, #tpu.memory_space<vmem>>, %arg15: memref<1x1x256xf32, #tpu.memory_space<vmem>>, %arg16: memref<1x256x128xf32, #tpu.memory_space<vmem>>, %arg17: memref<1x1x128xf32, #tpu.memory_space<vmem>>, %arg18: memref<1x128xf32, #tpu.memory_space<vmem>>, %arg19: memref<1x128xf32, #tpu.memory_space<vmem>>, %arg20: memref<2x128xf32, #tpu.memory_space<vmem>>, %arg21: memref<16x128xf32, #tpu.memory_space<vmem>>) attributes {dimension_semantics = [#tpu.dimension_semantics<arbitrary>], iteration_bounds = array<i64: 2>, scalar_prefetch = 0 : i64, scratch_operands = 1 : i64, tpu.core_type = #tpu.core_type<tc>, window_params = [{pipeline_mode = #tpu.pipeline_mode<synchronous>, transform_indices = @transform_0, window_bounds = array<i64: 16, 128>}, {pipeline_mode = #tpu.pipeline_mode<synchronous>, transform_indices = @transform_1, window_bounds = array<i64: 16, 16>}, {pipeline_mode = #tpu.pipeline_mode<synchronous>, transform_indices = @transform_2, window_bounds = array<i64: 16, 32>}, {pipeline_mode = #tpu.pipeline_mode<synchronous>, transform_indices = @transform_3, window_bounds = array<i64: 16, 32>}, {pipeline_mode = #tpu.pipeline_mode<synchronous>, transform_indices = @transform_4, window_bounds = array<i64: 2, 16>}, {transform_indices = @transform_5, window_bounds = array<i64: 1, 1, 128>}, {transform_indices = @transform_6, window_bounds = array<i64: 1, 1, 128>}, {transform_indices = @transform_7, window_bounds = array<i64: 1, 128, 384>}, {transform_indices = @transform_8, window_bounds = array<i64: 1, 1, 384>}, {transform_indices = @transform_9, window_bounds = array<i64: 1, 128, 128>}, {transform_indices = @transform_10, window_bounds = array<i64: 1, 1, 128>}, {transform_indices = @transform_11, window_bounds = array<i64: 1, 1, 128>}, {transform_indices = @transform_12, window_bounds = array<i64: 1, 1, 128>}, {transform_indices = @transform_13, window_bounds = array<i64: 1, 128, 256>}, {transform_indices = @transform_14, window_bounds = array<i64: 1, 1, 256>}, {transform_indices = @transform_15, window_bounds = array<i64: 1, 256, 128>}, {transform_indices = @transform_16, window_bounds = array<i64: 1, 1, 128>}, {pipeline_mode = #tpu.pipeline_mode<synchronous>, transform_indices = @transform_17, window_bounds = array<i64: 1, 128>}, {pipeline_mode = #tpu.pipeline_mode<synchronous>, transform_indices = @transform_18, window_bounds = array<i64: 1, 128>}, {pipeline_mode = #tpu.pipeline_mode<synchronous>, transform_indices = @transform_19, window_bounds = array<i64: 2, 128>}]} {
    %c0_i32 = arith.constant 0 : i32
    %0 = arith.cmpi eq, %arg0, %c0_i32 : i32
    %1 = arith.extui %0 : i1 to i32
    %c0_i32_0 = arith.constant 0 : i32
    %2 = arith.cmpi ne, %1, %c0_i32_0 : i32
    scf.if %2 {
      %c0_104 = arith.constant 0 : index
      %c0_105 = arith.constant 0 : index
      %275 = vector.load %arg1[%c0_104, %c0_105] : memref<16x128xf32, #tpu.memory_space<vmem>>, vector<16x128xf32>
      %c0_106 = arith.constant 0 : index
      %c0_107 = arith.constant 0 : index
      %276 = vector.load %arg21[%c0_106, %c0_107] : memref<16x128xf32, #tpu.memory_space<vmem>>, vector<16x128xf32>
      tpu.vector_store %arg21[%c0_106, %c0_107], %275 {strides = array<i32>} : memref<16x128xf32, #tpu.memory_space<vmem>>, vector<16x128xf32>,
    } else {
    }
    %c0 = arith.constant 0 : index
    %c0_1 = arith.constant 0 : index
    %3 = vector.load %arg21[%c0, %c0_1] : memref<16x128xf32, #tpu.memory_space<vmem>>, vector<16x128xf32>
    %c0_2 = arith.constant 0 : index
    %c0_3 = arith.constant 0 : index
    %4 = vector.load %arg3[%c0_2, %c0_3] : memref<16x32xf32, #tpu.memory_space<vmem>>, vector<16x32xf32>
    %c0_4 = arith.constant 0 : index
    %c0_5 = arith.constant 0 : index
    %5 = vector.load %arg4[%c0_4, %c0_5] : memref<16x32xf32, #tpu.memory_space<vmem>>, vector<16x32xf32>
    %c0_6 = arith.constant 0 : index
    %c0_7 = arith.constant 0 : index
    %6 = vector.load %arg2[%c0_6, %c0_7] : memref<16x16xf32, #tpu.memory_space<vmem>>, vector<16x16xf32>
    %c0_8 = arith.constant 0 : index
    %c0_9 = arith.constant 0 : index
    %c0_10 = arith.constant 0 : index
    %7 = vector.load %arg6[%c0_8, %c0_9, %c0_10] : memref<1x1x128xf32, #tpu.memory_space<vmem>>, vector<1x1x128xf32>
    %8 = vector.shape_cast %7 : vector<1x1x128xf32> to vector<1x128xf32>
    %c0_11 = arith.constant 0 : index
    %c0_12 = arith.constant 0 : index
    %c0_13 = arith.constant 0 : index
    %9 = vector.load %arg7[%c0_11, %c0_12, %c0_13] : memref<1x1x128xf32, #tpu.memory_space<vmem>>, vector<1x1x128xf32>
    %10 = vector.shape_cast %9 : vector<1x1x128xf32> to vector<1x128xf32>
    %cst = arith.constant dense<0.000000e+00> : vector<16xf32>
    %11 = vector.multi_reduction <add>, %3, %cst [1] : vector<16x128xf32> to vector<16xf32>
    %12 = vector.shape_cast %11 : vector<16xf32> to vector<16x1xf32>
    %cst_14 = arith.constant 1.280000e+02 : f32
    %13 = vector.broadcast %cst_14 : f32 to vector<16x1xf32>
    %14 = arith.divf %12, %13 : vector<16x1xf32>
    %15 = vector.broadcast %14 : vector<16x1xf32> to vector<16x128xf32>
    %16 = arith.subf %3, %15 : vector<16x128xf32>
    %17 = arith.mulf %16, %16 : vector<16x128xf32>
    %cst_15 = arith.constant dense<0.000000e+00> : vector<16xf32>
    %18 = vector.multi_reduction <add>, %17, %cst_15 [1] : vector<16x128xf32> to vector<16xf32>
    %19 = vector.shape_cast %18 : vector<16xf32> to vector<16x1xf32>
    %cst_16 = arith.constant 1.280000e+02 : f32
    %20 = vector.broadcast %cst_16 : f32 to vector<16x1xf32>
    %21 = arith.divf %19, %20 : vector<16x1xf32>
    %22 = vector.broadcast %14 : vector<16x1xf32> to vector<16x128xf32>
    %23 = arith.subf %3, %22 : vector<16x128xf32>
    %cst_17 = arith.constant 9.99999974E-6 : f32
    %24 = vector.broadcast %cst_17 : f32 to vector<16x1xf32>
    %25 = arith.addf %21, %24 : vector<16x1xf32>
    %26 = math.rsqrt %25 : vector<16x1xf32>
    %27 = vector.broadcast %26 : vector<16x1xf32> to vector<16x128xf32>
    %28 = arith.mulf %23, %27 : vector<16x128xf32>
    %29 = vector.broadcast %8 : vector<1x128xf32> to vector<16x128xf32>
    %30 = arith.mulf %28, %29 : vector<16x128xf32>
    %31 = vector.broadcast %10 : vector<1x128xf32> to vector<16x128xf32>
    %32 = arith.addf %30, %31 : vector<16x128xf32>
    %c0_18 = arith.constant 0 : index
    %c0_19 = arith.constant 0 : index
    %c0_20 = arith.constant 0 : index
    %33 = vector.load %arg8[%c0_18, %c0_19, %c0_20] : memref<1x128x384xf32, #tpu.memory_space<vmem>>, vector<1x128x384xf32>
    %34 = vector.shape_cast %33 : vector<1x128x384xf32> to vector<128x384xf32>
    %cst_21 = arith.constant dense<0.000000e+00> : vector<16x384xf32>
    %35 = tpu.matmul %32, %34, %cst_21 {dimension_numbers = #tpu.dot_dimension_numbers<[1], [0], [0], [1], [0, 0, 1, 1], [], []>} : vector<16x128xf32>, vector<128x384xf32>, vector<16x384xf32> -> vector<16x384xf32>
    %c0_22 = arith.constant 0 : index
    %c0_23 = arith.constant 0 : index
    %c0_24 = arith.constant 0 : index
    %36 = vector.load %arg9[%c0_22, %c0_23, %c0_24] : memref<1x1x384xf32, #tpu.memory_space<vmem>>, vector<1x1x384xf32>
    %37 = vector.shape_cast %36 : vector<1x1x384xf32> to vector<1x384xf32>
    %38 = vector.broadcast %37 : vector<1x384xf32> to vector<16x384xf32>
    %39 = arith.addf %35, %38 : vector<16x384xf32>
    %40 = vector.extract_strided_slice %39 {offsets = [0, 0], sizes = [16, 32], strides = [1, 1]} : vector<16x384xf32> to vector<16x32xf32>
    %41 = vector.extract_strided_slice %39 {offsets = [0, 128], sizes = [16, 32], strides = [1, 1]} : vector<16x384xf32> to vector<16x32xf32>
    %42 = vector.extract_strided_slice %39 {offsets = [0, 256], sizes = [16, 32], strides = [1, 1]} : vector<16x384xf32> to vector<16x32xf32>
    %43 = vector.extract_strided_slice %40 {offsets = [0, 0], sizes = [16, 16], strides = [1, 1]} : vector<16x32xf32> to vector<16x16xf32>
    %44 = vector.extract_strided_slice %40 {offsets = [0, 16], sizes = [16, 16], strides = [1, 1]} : vector<16x32xf32> to vector<16x16xf32>
    %45 = arith.mulf %40, %4 : vector<16x32xf32>
    %cst_25 = arith.constant 0.000000e+00 : f32
    %46 = vector.broadcast %cst_25 : f32 to vector<16x16xf32>
    %47 = arith.subf %46, %44 : vector<16x16xf32>
    %48 = tpu.concatenate %47, %43 in 1 : vector<16x16xf32>, vector<16x16xf32> -> vector<16x32xf32>
    %49 = arith.mulf %48, %5 : vector<16x32xf32>
    %50 = arith.addf %45, %49 : vector<16x32xf32>
    %cst_26 = arith.constant 0.176776692 : f32
    %51 = vector.broadcast %cst_26 : f32 to vector<16x32xf32>
    %52 = arith.mulf %50, %51 : vector<16x32xf32>
    %53 = vector.extract_strided_slice %41 {offsets = [0, 0], sizes = [16, 16], strides = [1, 1]} : vector<16x32xf32> to vector<16x16xf32>
    %54 = vector.extract_strided_slice %41 {offsets = [0, 16], sizes = [16, 16], strides = [1, 1]} : vector<16x32xf32> to vector<16x16xf32>
    %55 = arith.mulf %41, %4 : vector<16x32xf32>
    %cst_27 = arith.constant 0.000000e+00 : f32
    %56 = vector.broadcast %cst_27 : f32 to vector<16x16xf32>
    %57 = arith.subf %56, %54 : vector<16x16xf32>
    %58 = tpu.concatenate %57, %53 in 1 : vector<16x16xf32>, vector<16x16xf32> -> vector<16x32xf32>
    %59 = arith.mulf %58, %5 : vector<16x32xf32>
    %60 = arith.addf %55, %59 : vector<16x32xf32>
    %61 = tpu.transpose %60, [1, 0] : vector<16x32xf32> -> vector<32x16xf32>
    %cst_28 = arith.constant dense<0.000000e+00> : vector<16x16xf32>
    %62 = tpu.matmul %52, %61, %cst_28 {dimension_numbers = #tpu.dot_dimension_numbers<[1], [0], [0], [1], [0, 0, 1, 1], [], []>} : vector<16x32xf32>, vector<32x16xf32>, vector<16x16xf32> -> vector<16x16xf32>
    %63 = arith.addf %62, %6 : vector<16x16xf32>
    %cst_29 = arith.constant dense<0xFF800000> : vector<16xf32>
    %64 = vector.multi_reduction <maximumf>, %63, %cst_29 [1] : vector<16x16xf32> to vector<16xf32>
    %65 = vector.shape_cast %64 : vector<16xf32> to vector<16x1xf32>
    %66 = vector.broadcast %65 : vector<16x1xf32> to vector<16x16xf32>
    %67 = arith.subf %63, %66 : vector<16x16xf32>
    %68 = math.exp %67 : vector<16x16xf32>
    %cst_30 = arith.constant dense<0.000000e+00> : vector<16xf32>
    %69 = vector.multi_reduction <add>, %68, %cst_30 [1] : vector<16x16xf32> to vector<16xf32>
    %70 = vector.shape_cast %69 : vector<16xf32> to vector<16x1xf32>
    %71 = tpu.reciprocal %70 {approx = true} : vector<16x1xf32> -> vector<16x1xf32>
    %72 = vector.broadcast %71 : vector<16x1xf32> to vector<16x16xf32>
    %73 = arith.mulf %68, %72 : vector<16x16xf32>
    %cst_31 = arith.constant dense<0.000000e+00> : vector<16x32xf32>
    %74 = tpu.matmul %73, %42, %cst_31 {dimension_numbers = #tpu.dot_dimension_numbers<[1], [0], [0], [1], [0, 0, 1, 1], [], []>} : vector<16x16xf32>, vector<16x32xf32>, vector<16x32xf32> -> vector<16x32xf32>
    %75 = vector.extract_strided_slice %39 {offsets = [0, 32], sizes = [16, 32], strides = [1, 1]} : vector<16x384xf32> to vector<16x32xf32>
    %76 = vector.extract_strided_slice %39 {offsets = [0, 160], sizes = [16, 32], strides = [1, 1]} : vector<16x384xf32> to vector<16x32xf32>
    %77 = vector.extract_strided_slice %39 {offsets = [0, 288], sizes = [16, 32], strides = [1, 1]} : vector<16x384xf32> to vector<16x32xf32>
    %78 = vector.extract_strided_slice %75 {offsets = [0, 0], sizes = [16, 16], strides = [1, 1]} : vector<16x32xf32> to vector<16x16xf32>
    %79 = vector.extract_strided_slice %75 {offsets = [0, 16], sizes = [16, 16], strides = [1, 1]} : vector<16x32xf32> to vector<16x16xf32>
    %80 = arith.mulf %75, %4 : vector<16x32xf32>
    %cst_32 = arith.constant 0.000000e+00 : f32
    %81 = vector.broadcast %cst_32 : f32 to vector<16x16xf32>
    %82 = arith.subf %81, %79 : vector<16x16xf32>
    %83 = tpu.concatenate %82, %78 in 1 : vector<16x16xf32>, vector<16x16xf32> -> vector<16x32xf32>
    %84 = arith.mulf %83, %5 : vector<16x32xf32>
    %85 = arith.addf %80, %84 : vector<16x32xf32>
    %cst_33 = arith.constant 0.176776692 : f32
    %86 = vector.broadcast %cst_33 : f32 to vector<16x32xf32>
    %87 = arith.mulf %85, %86 : vector<16x32xf32>
    %88 = vector.extract_strided_slice %76 {offsets = [0, 0], sizes = [16, 16], strides = [1, 1]} : vector<16x32xf32> to vector<16x16xf32>
    %89 = vector.extract_strided_slice %76 {offsets = [0, 16], sizes = [16, 16], strides = [1, 1]} : vector<16x32xf32> to vector<16x16xf32>
    %90 = arith.mulf %76, %4 : vector<16x32xf32>
    %cst_34 = arith.constant 0.000000e+00 : f32
    %91 = vector.broadcast %cst_34 : f32 to vector<16x16xf32>
    %92 = arith.subf %91, %89 : vector<16x16xf32>
    %93 = tpu.concatenate %92, %88 in 1 : vector<16x16xf32>, vector<16x16xf32> -> vector<16x32xf32>
    %94 = arith.mulf %93, %5 : vector<16x32xf32>
    %95 = arith.addf %90, %94 : vector<16x32xf32>
    %96 = tpu.transpose %95, [1, 0] : vector<16x32xf32> -> vector<32x16xf32>
    %cst_35 = arith.constant dense<0.000000e+00> : vector<16x16xf32>
    %97 = tpu.matmul %87, %96, %cst_35 {dimension_numbers = #tpu.dot_dimension_numbers<[1], [0], [0], [1], [0, 0, 1, 1], [], []>} : vector<16x32xf32>, vector<32x16xf32>, vector<16x16xf32> -> vector<16x16xf32>
    %98 = arith.addf %97, %6 : vector<16x16xf32>
    %cst_36 = arith.constant dense<0xFF800000> : vector<16xf32>
    %99 = vector.multi_reduction <maximumf>, %98, %cst_36 [1] : vector<16x16xf32> to vector<16xf32>
    %100 = vector.shape_cast %99 : vector<16xf32> to vector<16x1xf32>
    %101 = vector.broadcast %100 : vector<16x1xf32> to vector<16x16xf32>
    %102 = arith.subf %98, %101 : vector<16x16xf32>
    %103 = math.exp %102 : vector<16x16xf32>
    %cst_37 = arith.constant dense<0.000000e+00> : vector<16xf32>
    %104 = vector.multi_reduction <add>, %103, %cst_37 [1] : vector<16x16xf32> to vector<16xf32>
    %105 = vector.shape_cast %104 : vector<16xf32> to vector<16x1xf32>
    %106 = tpu.reciprocal %105 {approx = true} : vector<16x1xf32> -> vector<16x1xf32>
    %107 = vector.broadcast %106 : vector<16x1xf32> to vector<16x16xf32>
    %108 = arith.mulf %103, %107 : vector<16x16xf32>
    %cst_38 = arith.constant dense<0.000000e+00> : vector<16x32xf32>
    %109 = tpu.matmul %108, %77, %cst_38 {dimension_numbers = #tpu.dot_dimension_numbers<[1], [0], [0], [1], [0, 0, 1, 1], [], []>} : vector<16x16xf32>, vector<16x32xf32>, vector<16x32xf32> -> vector<16x32xf32>
    %110 = vector.extract_strided_slice %39 {offsets = [0, 64], sizes = [16, 32], strides = [1, 1]} : vector<16x384xf32> to vector<16x32xf32>
    %111 = vector.extract_strided_slice %39 {offsets = [0, 192], sizes = [16, 32], strides = [1, 1]} : vector<16x384xf32> to vector<16x32xf32>
    %112 = vector.extract_strided_slice %39 {offsets = [0, 320], sizes = [16, 32], strides = [1, 1]} : vector<16x384xf32> to vector<16x32xf32>
    %113 = vector.extract_strided_slice %110 {offsets = [0, 0], sizes = [16, 16], strides = [1, 1]} : vector<16x32xf32> to vector<16x16xf32>
    %114 = vector.extract_strided_slice %110 {offsets = [0, 16], sizes = [16, 16], strides = [1, 1]} : vector<16x32xf32> to vector<16x16xf32>
    %115 = arith.mulf %110, %4 : vector<16x32xf32>
    %cst_39 = arith.constant 0.000000e+00 : f32
    %116 = vector.broadcast %cst_39 : f32 to vector<16x16xf32>
    %117 = arith.subf %116, %114 : vector<16x16xf32>
    %118 = tpu.concatenate %117, %113 in 1 : vector<16x16xf32>, vector<16x16xf32> -> vector<16x32xf32>
    %119 = arith.mulf %118, %5 : vector<16x32xf32>
    %120 = arith.addf %115, %119 : vector<16x32xf32>
    %cst_40 = arith.constant 0.176776692 : f32
    %121 = vector.broadcast %cst_40 : f32 to vector<16x32xf32>
    %122 = arith.mulf %120, %121 : vector<16x32xf32>
    %123 = vector.extract_strided_slice %111 {offsets = [0, 0], sizes = [16, 16], strides = [1, 1]} : vector<16x32xf32> to vector<16x16xf32>
    %124 = vector.extract_strided_slice %111 {offsets = [0, 16], sizes = [16, 16], strides = [1, 1]} : vector<16x32xf32> to vector<16x16xf32>
    %125 = arith.mulf %111, %4 : vector<16x32xf32>
    %cst_41 = arith.constant 0.000000e+00 : f32
    %126 = vector.broadcast %cst_41 : f32 to vector<16x16xf32>
    %127 = arith.subf %126, %124 : vector<16x16xf32>
    %128 = tpu.concatenate %127, %123 in 1 : vector<16x16xf32>, vector<16x16xf32> -> vector<16x32xf32>
    %129 = arith.mulf %128, %5 : vector<16x32xf32>
    %130 = arith.addf %125, %129 : vector<16x32xf32>
    %131 = tpu.transpose %130, [1, 0] : vector<16x32xf32> -> vector<32x16xf32>
    %cst_42 = arith.constant dense<0.000000e+00> : vector<16x16xf32>
    %132 = tpu.matmul %122, %131, %cst_42 {dimension_numbers = #tpu.dot_dimension_numbers<[1], [0], [0], [1], [0, 0, 1, 1], [], []>} : vector<16x32xf32>, vector<32x16xf32>, vector<16x16xf32> -> vector<16x16xf32>
    %133 = arith.addf %132, %6 : vector<16x16xf32>
    %cst_43 = arith.constant dense<0xFF800000> : vector<16xf32>
    %134 = vector.multi_reduction <maximumf>, %133, %cst_43 [1] : vector<16x16xf32> to vector<16xf32>
    %135 = vector.shape_cast %134 : vector<16xf32> to vector<16x1xf32>
    %136 = vector.broadcast %135 : vector<16x1xf32> to vector<16x16xf32>
    %137 = arith.subf %133, %136 : vector<16x16xf32>
    %138 = math.exp %137 : vector<16x16xf32>
    %cst_44 = arith.constant dense<0.000000e+00> : vector<16xf32>
    %139 = vector.multi_reduction <add>, %138, %cst_44 [1] : vector<16x16xf32> to vector<16xf32>
    %140 = vector.shape_cast %139 : vector<16xf32> to vector<16x1xf32>
    %141 = tpu.reciprocal %140 {approx = true} : vector<16x1xf32> -> vector<16x1xf32>
    %142 = vector.broadcast %141 : vector<16x1xf32> to vector<16x16xf32>
    %143 = arith.mulf %138, %142 : vector<16x16xf32>
    %cst_45 = arith.constant dense<0.000000e+00> : vector<16x32xf32>
    %144 = tpu.matmul %143, %112, %cst_45 {dimension_numbers = #tpu.dot_dimension_numbers<[1], [0], [0], [1], [0, 0, 1, 1], [], []>} : vector<16x16xf32>, vector<16x32xf32>, vector<16x32xf32> -> vector<16x32xf32>
    %145 = vector.extract_strided_slice %39 {offsets = [0, 96], sizes = [16, 32], strides = [1, 1]} : vector<16x384xf32> to vector<16x32xf32>
    %146 = vector.extract_strided_slice %39 {offsets = [0, 224], sizes = [16, 32], strides = [1, 1]} : vector<16x384xf32> to vector<16x32xf32>
    %147 = vector.extract_strided_slice %39 {offsets = [0, 352], sizes = [16, 32], strides = [1, 1]} : vector<16x384xf32> to vector<16x32xf32>
    %148 = vector.extract_strided_slice %145 {offsets = [0, 0], sizes = [16, 16], strides = [1, 1]} : vector<16x32xf32> to vector<16x16xf32>
    %149 = vector.extract_strided_slice %145 {offsets = [0, 16], sizes = [16, 16], strides = [1, 1]} : vector<16x32xf32> to vector<16x16xf32>
    %150 = arith.mulf %145, %4 : vector<16x32xf32>
    %cst_46 = arith.constant 0.000000e+00 : f32
    %151 = vector.broadcast %cst_46 : f32 to vector<16x16xf32>
    %152 = arith.subf %151, %149 : vector<16x16xf32>
    %153 = tpu.concatenate %152, %148 in 1 : vector<16x16xf32>, vector<16x16xf32> -> vector<16x32xf32>
    %154 = arith.mulf %153, %5 : vector<16x32xf32>
    %155 = arith.addf %150, %154 : vector<16x32xf32>
    %cst_47 = arith.constant 0.176776692 : f32
    %156 = vector.broadcast %cst_47 : f32 to vector<16x32xf32>
    %157 = arith.mulf %155, %156 : vector<16x32xf32>
    %158 = vector.extract_strided_slice %146 {offsets = [0, 0], sizes = [16, 16], strides = [1, 1]} : vector<16x32xf32> to vector<16x16xf32>
    %159 = vector.extract_strided_slice %146 {offsets = [0, 16], sizes = [16, 16], strides = [1, 1]} : vector<16x32xf32> to vector<16x16xf32>
    %160 = arith.mulf %146, %4 : vector<16x32xf32>
    %cst_48 = arith.constant 0.000000e+00 : f32
    %161 = vector.broadcast %cst_48 : f32 to vector<16x16xf32>
    %162 = arith.subf %161, %159 : vector<16x16xf32>
    %163 = tpu.concatenate %162, %158 in 1 : vector<16x16xf32>, vector<16x16xf32> -> vector<16x32xf32>
    %164 = arith.mulf %163, %5 : vector<16x32xf32>
    %165 = arith.addf %160, %164 : vector<16x32xf32>
    %166 = tpu.transpose %165, [1, 0] : vector<16x32xf32> -> vector<32x16xf32>
    %cst_49 = arith.constant dense<0.000000e+00> : vector<16x16xf32>
    %167 = tpu.matmul %157, %166, %cst_49 {dimension_numbers = #tpu.dot_dimension_numbers<[1], [0], [0], [1], [0, 0, 1, 1], [], []>} : vector<16x32xf32>, vector<32x16xf32>, vector<16x16xf32> -> vector<16x16xf32>
    %168 = arith.addf %167, %6 : vector<16x16xf32>
    %cst_50 = arith.constant dense<0xFF800000> : vector<16xf32>
    %169 = vector.multi_reduction <maximumf>, %168, %cst_50 [1] : vector<16x16xf32> to vector<16xf32>
    %170 = vector.shape_cast %169 : vector<16xf32> to vector<16x1xf32>
    %171 = vector.broadcast %170 : vector<16x1xf32> to vector<16x16xf32>
    %172 = arith.subf %168, %171 : vector<16x16xf32>
    %173 = math.exp %172 : vector<16x16xf32>
    %cst_51 = arith.constant dense<0.000000e+00> : vector<16xf32>
    %174 = vector.multi_reduction <add>, %173, %cst_51 [1] : vector<16x16xf32> to vector<16xf32>
    %175 = vector.shape_cast %174 : vector<16xf32> to vector<16x1xf32>
    %176 = tpu.reciprocal %175 {approx = true} : vector<16x1xf32> -> vector<16x1xf32>
    %177 = vector.broadcast %176 : vector<16x1xf32> to vector<16x16xf32>
    %178 = arith.mulf %173, %177 : vector<16x16xf32>
    %cst_52 = arith.constant dense<0.000000e+00> : vector<16x32xf32>
    %179 = tpu.matmul %178, %147, %cst_52 {dimension_numbers = #tpu.dot_dimension_numbers<[1], [0], [0], [1], [0, 0, 1, 1], [], []>} : vector<16x16xf32>, vector<16x32xf32>, vector<16x32xf32> -> vector<16x32xf32>
    %180 = tpu.concatenate %74, %109, %144, %179 in 1 : vector<16x32xf32>, vector<16x32xf32>, vector<16x32xf32>, vector<16x32xf32> -> vector<16x128xf32>
    %c0_53 = arith.constant 0 : index
    %c0_54 = arith.constant 0 : index
    %c0_55 = arith.constant 0 : index
    %181 = vector.load %arg10[%c0_53, %c0_54, %c0_55] : memref<1x128x128xf32, #tpu.memory_space<vmem>>, vector<1x128x128xf32>
    %182 = vector.shape_cast %181 : vector<1x128x128xf32> to vector<128x128xf32>
    %cst_56 = arith.constant dense<0.000000e+00> : vector<16x128xf32>
    %183 = tpu.matmul %180, %182, %cst_56 {dimension_numbers = #tpu.dot_dimension_numbers<[1], [0], [0], [1], [0, 0, 1, 1], [], []>} : vector<16x128xf32>, vector<128x128xf32>, vector<16x128xf32> -> vector<16x128xf32>
    %c0_57 = arith.constant 0 : index
    %c0_58 = arith.constant 0 : index
    %c0_59 = arith.constant 0 : index
    %184 = vector.load %arg11[%c0_57, %c0_58, %c0_59] : memref<1x1x128xf32, #tpu.memory_space<vmem>>, vector<1x1x128xf32>
    %185 = vector.shape_cast %184 : vector<1x1x128xf32> to vector<1x128xf32>
    %186 = vector.broadcast %185 : vector<1x128xf32> to vector<16x128xf32>
    %187 = arith.addf %183, %186 : vector<16x128xf32>
    %188 = arith.addf %187, %3 : vector<16x128xf32>
    %c0_60 = arith.constant 0 : index
    %c0_61 = arith.constant 0 : index
    %c0_62 = arith.constant 0 : index
    %189 = vector.load %arg12[%c0_60, %c0_61, %c0_62] : memref<1x1x128xf32, #tpu.memory_space<vmem>>, vector<1x1x128xf32>
    %190 = vector.shape_cast %189 : vector<1x1x128xf32> to vector<1x128xf32>
    %c0_63 = arith.constant 0 : index
    %c0_64 = arith.constant 0 : index
    %c0_65 = arith.constant 0 : index
    %191 = vector.load %arg13[%c0_63, %c0_64, %c0_65] : memref<1x1x128xf32, #tpu.memory_space<vmem>>, vector<1x1x128xf32>
    %192 = vector.shape_cast %191 : vector<1x1x128xf32> to vector<1x128xf32>
    %cst_66 = arith.constant dense<0.000000e+00> : vector<16xf32>
    %193 = vector.multi_reduction <add>, %188, %cst_66 [1] : vector<16x128xf32> to vector<16xf32>
    %194 = vector.shape_cast %193 : vector<16xf32> to vector<16x1xf32>
    %cst_67 = arith.constant 1.280000e+02 : f32
    %195 = vector.broadcast %cst_67 : f32 to vector<16x1xf32>
    %196 = arith.divf %194, %195 : vector<16x1xf32>
    %197 = vector.broadcast %196 : vector<16x1xf32> to vector<16x128xf32>
    %198 = arith.subf %188, %197 : vector<16x128xf32>
    %199 = arith.mulf %198, %198 : vector<16x128xf32>
    %cst_68 = arith.constant dense<0.000000e+00> : vector<16xf32>
    %200 = vector.multi_reduction <add>, %199, %cst_68 [1] : vector<16x128xf32> to vector<16xf32>
    %201 = vector.shape_cast %200 : vector<16xf32> to vector<16x1xf32>
    %cst_69 = arith.constant 1.280000e+02 : f32
    %202 = vector.broadcast %cst_69 : f32 to vector<16x1xf32>
    %203 = arith.divf %201, %202 : vector<16x1xf32>
    %204 = vector.broadcast %196 : vector<16x1xf32> to vector<16x128xf32>
    %205 = arith.subf %188, %204 : vector<16x128xf32>
    %cst_70 = arith.constant 9.99999974E-6 : f32
    %206 = vector.broadcast %cst_70 : f32 to vector<16x1xf32>
    %207 = arith.addf %203, %206 : vector<16x1xf32>
    %208 = math.rsqrt %207 : vector<16x1xf32>
    %209 = vector.broadcast %208 : vector<16x1xf32> to vector<16x128xf32>
    %210 = arith.mulf %205, %209 : vector<16x128xf32>
    %211 = vector.broadcast %190 : vector<1x128xf32> to vector<16x128xf32>
    %212 = arith.mulf %210, %211 : vector<16x128xf32>
    %213 = vector.broadcast %192 : vector<1x128xf32> to vector<16x128xf32>
    %214 = arith.addf %212, %213 : vector<16x128xf32>
    %c0_71 = arith.constant 0 : index
    %c0_72 = arith.constant 0 : index
    %c0_73 = arith.constant 0 : index
    %215 = vector.load %arg14[%c0_71, %c0_72, %c0_73] : memref<1x128x256xf32, #tpu.memory_space<vmem>>, vector<1x128x256xf32>
    %216 = vector.shape_cast %215 : vector<1x128x256xf32> to vector<128x256xf32>
    %cst_74 = arith.constant dense<0.000000e+00> : vector<16x256xf32>
    %217 = tpu.matmul %214, %216, %cst_74 {dimension_numbers = #tpu.dot_dimension_numbers<[1], [0], [0], [1], [0, 0, 1, 1], [], []>} : vector<16x128xf32>, vector<128x256xf32>, vector<16x256xf32> -> vector<16x256xf32>
    %c0_75 = arith.constant 0 : index
    %c0_76 = arith.constant 0 : index
    %c0_77 = arith.constant 0 : index
    %218 = vector.load %arg15[%c0_75, %c0_76, %c0_77] : memref<1x1x256xf32, #tpu.memory_space<vmem>>, vector<1x1x256xf32>
    %219 = vector.shape_cast %218 : vector<1x1x256xf32> to vector<1x256xf32>
    %220 = vector.broadcast %219 : vector<1x256xf32> to vector<16x256xf32>
    %221 = arith.addf %217, %220 : vector<16x256xf32>
    %cst_78 = arith.constant 5.000000e-01 : f32
    %222 = vector.broadcast %cst_78 : f32 to vector<16x256xf32>
    %223 = arith.mulf %222, %221 : vector<16x256xf32>
    %cst_79 = arith.constant 0.707106769 : f32
    %224 = vector.broadcast %cst_79 : f32 to vector<16x256xf32>
    %225 = arith.mulf %221, %224 : vector<16x256xf32>
    %cst_80 = arith.constant 0.000000e+00 : f32
    %226 = vector.broadcast %cst_80 : f32 to vector<16x256xf32>
    %227 = arith.cmpf oge, %225, %226 : vector<16x256xf32>
    %cst_81 = arith.constant 1.000000e+00 : f32
    %cst_82 = arith.constant -1.000000e+00 : f32
    %228 = vector.broadcast %cst_81 : f32 to vector<16x256xf32>
    %229 = vector.broadcast %cst_82 : f32 to vector<16x256xf32>
    %230 = arith.select %227, %228, %229 : vector<16x256xi1>, vector<16x256xf32>
    %231 = math.absf %225 : vector<16x256xf32>
    %cst_83 = arith.constant 0.327591091 : f32
    %232 = vector.broadcast %cst_83 : f32 to vector<16x256xf32>
    %233 = arith.mulf %232, %231 : vector<16x256xf32>
    %cst_84 = arith.constant 1.000000e+00 : f32
    %234 = vector.broadcast %cst_84 : f32 to vector<16x256xf32>
    %235 = arith.addf %234, %233 : vector<16x256xf32>
    %cst_85 = arith.constant 1.000000e+00 : f32
    %236 = vector.broadcast %cst_85 : f32 to vector<16x256xf32>
    %237 = arith.divf %236, %235 : vector<16x256xf32>
    %cst_86 = arith.constant 1.06140542 : f32
    %238 = vector.broadcast %cst_86 : f32 to vector<16x256xf32>
    %239 = arith.mulf %238, %237 : vector<16x256xf32>
    %cst_87 = arith.constant -1.45315206 : f32
    %240 = vector.broadcast %cst_87 : f32 to vector<16x256xf32>
    %241 = arith.addf %239, %240 : vector<16x256xf32>
    %242 = arith.mulf %241, %237 : vector<16x256xf32>
    %cst_88 = arith.constant 1.42141378 : f32
    %243 = vector.broadcast %cst_88 : f32 to vector<16x256xf32>
    %244 = arith.addf %242, %243 : vector<16x256xf32>
    %245 = arith.mulf %244, %237 : vector<16x256xf32>
    %cst_89 = arith.constant -0.284496725 : f32
    %246 = vector.broadcast %cst_89 : f32 to vector<16x256xf32>
    %247 = arith.addf %245, %246 : vector<16x256xf32>
    %248 = arith.mulf %247, %237 : vector<16x256xf32>
    %cst_90 = arith.constant 0.254829586 : f32
    %249 = vector.broadcast %cst_90 : f32 to vector<16x256xf32>
    %250 = arith.addf %248, %249 : vector<16x256xf32>
    %251 = arith.mulf %250, %237 : vector<16x256xf32>
    %cst_91 = arith.constant 0.000000e+00 : f32
    %252 = vector.broadcast %cst_91 : f32 to vector<16x256xf32>
    %253 = arith.subf %252, %231 : vector<16x256xf32>
    %254 = arith.mulf %253, %231 : vector<16x256xf32>
    %255 = math.exp %254 : vector<16x256xf32>
    %256 = arith.mulf %251, %255 : vector<16x256xf32>
    %cst_92 = arith.constant 1.000000e+00 : f32
    %257 = vector.broadcast %cst_92 : f32 to vector<16x256xf32>
    %258 = arith.subf %257, %256 : vector<16x256xf32>
    %259 = arith.mulf %230, %258 : vector<16x256xf32>
    %cst_93 = arith.constant 1.000000e+00 : f32
    %260 = vector.broadcast %cst_93 : f32 to vector<16x256xf32>
    %261 = arith.addf %260, %259 : vector<16x256xf32>
    %262 = arith.mulf %223, %261 : vector<16x256xf32>
    %c0_94 = arith.constant 0 : index
    %c0_95 = arith.constant 0 : index
    %c0_96 = arith.constant 0 : index
    %263 = vector.load %arg16[%c0_94, %c0_95, %c0_96] : memref<1x256x128xf32, #tpu.memory_space<vmem>>, vector<1x256x128xf32>
    %264 = vector.shape_cast %263 : vector<1x256x128xf32> to vector<256x128xf32>
    %cst_97 = arith.constant dense<0.000000e+00> : vector<16x128xf32>
    %265 = tpu.matmul %262, %264, %cst_97 {dimension_numbers = #tpu.dot_dimension_numbers<[1], [0], [0], [1], [0, 0, 1, 1], [], []>} : vector<16x256xf32>, vector<256x128xf32>, vector<16x128xf32> -> vector<16x128xf32>
    %c0_98 = arith.constant 0 : index
    %c0_99 = arith.constant 0 : index
    %c0_100 = arith.constant 0 : index
    %266 = vector.load %arg17[%c0_98, %c0_99, %c0_100] : memref<1x1x128xf32, #tpu.memory_space<vmem>>, vector<1x1x128xf32>
    %267 = vector.shape_cast %266 : vector<1x1x128xf32> to vector<1x128xf32>
    %268 = vector.broadcast %267 : vector<1x128xf32> to vector<16x128xf32>
    %269 = arith.addf %265, %268 : vector<16x128xf32>
    %270 = arith.addf %269, %188 : vector<16x128xf32>
    %c0_101 = arith.constant 0 : index
    %c0_102 = arith.constant 0 : index
    %271 = vector.load %arg21[%c0_101, %c0_102] : memref<16x128xf32, #tpu.memory_space<vmem>>, vector<16x128xf32>
    tpu.vector_store %arg21[%c0_101, %c0_102], %270 {strides = array<i32>} : memref<16x128xf32, #tpu.memory_space<vmem>>, vector<16x128xf32>,
    %c1_i32 = arith.constant 1 : i32
    %272 = arith.cmpi eq, %arg0, %c1_i32 : i32
    %273 = arith.extui %272 : i1 to i32
    %c0_i32_103 = arith.constant 0 : i32
    %274 = arith.cmpi ne, %273, %c0_i32_103 : i32
    scf.if %274 {
      %c0_104 = arith.constant 0 : index
      %c0_105 = arith.constant 0 : index
      %275 = vector.load %arg18[%c0_104, %c0_105] : memref<1x128xf32, #tpu.memory_space<vmem>>, vector<1x128xf32>
      %c0_106 = arith.constant 0 : index
      %c0_107 = arith.constant 0 : index
      %276 = vector.load %arg19[%c0_106, %c0_107] : memref<1x128xf32, #tpu.memory_space<vmem>>, vector<1x128xf32>
      %cst_108 = arith.constant dense<0.000000e+00> : vector<16xf32>
      %277 = vector.multi_reduction <add>, %270, %cst_108 [1] : vector<16x128xf32> to vector<16xf32>
      %278 = vector.shape_cast %277 : vector<16xf32> to vector<16x1xf32>
      %cst_109 = arith.constant 1.280000e+02 : f32
      %279 = vector.broadcast %cst_109 : f32 to vector<16x1xf32>
      %280 = arith.divf %278, %279 : vector<16x1xf32>
      %281 = vector.broadcast %280 : vector<16x1xf32> to vector<16x128xf32>
      %282 = arith.subf %270, %281 : vector<16x128xf32>
      %283 = arith.mulf %282, %282 : vector<16x128xf32>
      %cst_110 = arith.constant dense<0.000000e+00> : vector<16xf32>
      %284 = vector.multi_reduction <add>, %283, %cst_110 [1] : vector<16x128xf32> to vector<16xf32>
      %285 = vector.shape_cast %284 : vector<16xf32> to vector<16x1xf32>
      %cst_111 = arith.constant 1.280000e+02 : f32
      %286 = vector.broadcast %cst_111 : f32 to vector<16x1xf32>
      %287 = arith.divf %285, %286 : vector<16x1xf32>
      %288 = vector.broadcast %280 : vector<16x1xf32> to vector<16x128xf32>
      %289 = arith.subf %270, %288 : vector<16x128xf32>
      %cst_112 = arith.constant 9.99999974E-6 : f32
      %290 = vector.broadcast %cst_112 : f32 to vector<16x1xf32>
      %291 = arith.addf %287, %290 : vector<16x1xf32>
      %292 = math.rsqrt %291 : vector<16x1xf32>
      %293 = vector.broadcast %292 : vector<16x1xf32> to vector<16x128xf32>
      %294 = arith.mulf %289, %293 : vector<16x128xf32>
      %295 = vector.broadcast %275 : vector<1x128xf32> to vector<16x128xf32>
      %296 = arith.mulf %294, %295 : vector<16x128xf32>
      %297 = vector.broadcast %276 : vector<1x128xf32> to vector<16x128xf32>
      %298 = arith.addf %296, %297 : vector<16x128xf32>
      %c0_113 = arith.constant 0 : index
      %c0_114 = arith.constant 0 : index
      %299 = vector.load %arg5[%c0_113, %c0_114] : memref<2x16xf32, #tpu.memory_space<vmem>>, vector<2x16xf32>
      %cst_115 = arith.constant dense<0.000000e+00> : vector<2x128xf32>
      %300 = tpu.matmul %299, %298, %cst_115 {dimension_numbers = #tpu.dot_dimension_numbers<[1], [0], [0], [1], [0, 0, 1, 1], [], []>} : vector<2x16xf32>, vector<16x128xf32>, vector<2x128xf32> -> vector<2x128xf32>
      %c0_116 = arith.constant 0 : index
      %c0_117 = arith.constant 0 : index
      %301 = vector.load %arg20[%c0_116, %c0_117] : memref<2x128xf32, #tpu.memory_space<vmem>>, vector<2x128xf32>
      tpu.vector_store %arg20[%c0_116, %c0_117], %300 {strides = array<i32>} : memref<2x128xf32, #tpu.memory_space<vmem>>, vector<2x128xf32>,
    } else {
    }
    return
  }
  func.func @transform_0(%arg0: i32) -> (i32, i32) {
    %c0_i32 = arith.constant 0 : i32
    %c0_i32_0 = arith.constant 0 : i32
    %c0_i32_1 = arith.constant 0 : i32
    return %c0_i32, %c0_i32_0 : i32, i32
  }
  func.func @transform_1(%arg0: i32) -> (i32, i32) {
    %c0_i32 = arith.constant 0 : i32
    %c0_i32_0 = arith.constant 0 : i32
    %c0_i32_1 = arith.constant 0 : i32
    return %c0_i32, %c0_i32_0 : i32, i32
  }
  func.func @transform_2(%arg0: i32) -> (i32, i32) {
    %c0_i32 = arith.constant 0 : i32
    %c0_i32_0 = arith.constant 0 : i32
    %c0_i32_1 = arith.constant 0 : i32
    return %c0_i32, %c0_i32_0 : i32, i32
  }
  func.func @transform_3(%arg0: i32) -> (i32, i32) {
    %c0_i32 = arith.constant 0 : i32
    %c0_i32_0 = arith.constant 0 : i32
    %c0_i32_1 = arith.constant 0 : i32
    return %c0_i32, %c0_i32_0 : i32, i32
  }
  func.func @transform_4(%arg0: i32) -> (i32, i32) {
    %c0_i32 = arith.constant 0 : i32
    %c0_i32_0 = arith.constant 0 : i32
    %c0_i32_1 = arith.constant 0 : i32
    return %c0_i32, %c0_i32_0 : i32, i32
  }
  func.func @transform_5(%arg0: i32) -> (i32, i32, i32) {
    %c0_i32 = arith.constant 0 : i32
    %c0_i32_0 = arith.constant 0 : i32
    %c0_i32_1 = arith.constant 0 : i32
    return %arg0, %c0_i32, %c0_i32_0 : i32, i32, i32
  }
  func.func @transform_6(%arg0: i32) -> (i32, i32, i32) {
    %c0_i32 = arith.constant 0 : i32
    %c0_i32_0 = arith.constant 0 : i32
    %c0_i32_1 = arith.constant 0 : i32
    return %arg0, %c0_i32, %c0_i32_0 : i32, i32, i32
  }
  func.func @transform_7(%arg0: i32) -> (i32, i32, i32) {
    %c0_i32 = arith.constant 0 : i32
    %c0_i32_0 = arith.constant 0 : i32
    %c0_i32_1 = arith.constant 0 : i32
    return %arg0, %c0_i32, %c0_i32_0 : i32, i32, i32
  }
  func.func @transform_8(%arg0: i32) -> (i32, i32, i32) {
    %c0_i32 = arith.constant 0 : i32
    %c0_i32_0 = arith.constant 0 : i32
    %c0_i32_1 = arith.constant 0 : i32
    return %arg0, %c0_i32, %c0_i32_0 : i32, i32, i32
  }
  func.func @transform_9(%arg0: i32) -> (i32, i32, i32) {
    %c0_i32 = arith.constant 0 : i32
    %c0_i32_0 = arith.constant 0 : i32
    %c0_i32_1 = arith.constant 0 : i32
    return %arg0, %c0_i32, %c0_i32_0 : i32, i32, i32
  }
  func.func @transform_10(%arg0: i32) -> (i32, i32, i32) {
    %c0_i32 = arith.constant 0 : i32
    %c0_i32_0 = arith.constant 0 : i32
    %c0_i32_1 = arith.constant 0 : i32
    return %arg0, %c0_i32, %c0_i32_0 : i32, i32, i32
  }
  func.func @transform_11(%arg0: i32) -> (i32, i32, i32) {
    %c0_i32 = arith.constant 0 : i32
    %c0_i32_0 = arith.constant 0 : i32
    %c0_i32_1 = arith.constant 0 : i32
    return %arg0, %c0_i32, %c0_i32_0 : i32, i32, i32
  }
  func.func @transform_12(%arg0: i32) -> (i32, i32, i32) {
    %c0_i32 = arith.constant 0 : i32
    %c0_i32_0 = arith.constant 0 : i32
    %c0_i32_1 = arith.constant 0 : i32
    return %arg0, %c0_i32, %c0_i32_0 : i32, i32, i32
  }
  func.func @transform_13(%arg0: i32) -> (i32, i32, i32) {
    %c0_i32 = arith.constant 0 : i32
    %c0_i32_0 = arith.constant 0 : i32
    %c0_i32_1 = arith.constant 0 : i32
    return %arg0, %c0_i32, %c0_i32_0 : i32, i32, i32
  }
  func.func @transform_14(%arg0: i32) -> (i32, i32, i32) {
    %c0_i32 = arith.constant 0 : i32
    %c0_i32_0 = arith.constant 0 : i32
    %c0_i32_1 = arith.constant 0 : i32
    return %arg0, %c0_i32, %c0_i32_0 : i32, i32, i32
  }
  func.func @transform_15(%arg0: i32) -> (i32, i32, i32) {
    %c0_i32 = arith.constant 0 : i32
    %c0_i32_0 = arith.constant 0 : i32
    %c0_i32_1 = arith.constant 0 : i32
    return %arg0, %c0_i32, %c0_i32_0 : i32, i32, i32
  }
  func.func @transform_16(%arg0: i32) -> (i32, i32, i32) {
    %c0_i32 = arith.constant 0 : i32
    %c0_i32_0 = arith.constant 0 : i32
    %c0_i32_1 = arith.constant 0 : i32
    return %arg0, %c0_i32, %c0_i32_0 : i32, i32, i32
  }
  func.func @transform_17(%arg0: i32) -> (i32, i32) {
    %c0_i32 = arith.constant 0 : i32
    %c0_i32_0 = arith.constant 0 : i32
    %c0_i32_1 = arith.constant 0 : i32
    return %c0_i32, %c0_i32_0 : i32, i32
  }
  func.func @transform_18(%arg0: i32) -> (i32, i32) {
    %c0_i32 = arith.constant 0 : i32
    %c0_i32_0 = arith.constant 0 : i32
    %c0_i32_1 = arith.constant 0 : i32
    return %c0_i32, %c0_i32_0 : i32, i32
  }
  func.func @transform_19(%arg0: i32) -> (i32, i32) {
    %c0_i32 = arith.constant 0 : i32
    %c0_i32_0 = arith.constant 0 : i32
    %c0_i32_1 = arith.constant 0 : i32
    return %c0_i32, %c0_i32_0 : i32, i32
  }
}

</mosaic_0001>

<bundles_post_ra>
// kernel: palm_forward.3
= control target key start
LH: loop header
LB: loop body
LE: loop exit
PB: predicated region body
PF: predicated region fallthrough
CT: control target
= control target key end

     0   :  { %v337_v3 = vmov 0.0   ;;  %vm338_vm0 = vmmov 0   ;;  %vm237_vm1 = vcmask 1024   ;;  %s542_s1 = inlined_call_operand.vmem [shape: f32[256,128], index: 1, kind: input, shape index: {}]   ;;  %s543_s0 = inlined_call_operand.vmem [shape: f32[2,256], index: 0, kind: input, shape index: {}]   ;;  %s544_s3 = inlined_call_operand.vmem [shape: f32[128,1], index: 3, kind: input, shape index: {}]   ;;  %s545_s4 = inlined_call_operand.<no memory space> [shape: f32[1,1], index: 4, kind: input, shape index: {}]   ;;  %s546_s2 = inlined_call_operand.vmem [shape: f32[1,128], index: 2, kind: input, shape index: {}]   ;;  %s547_s5 = inlined_call_operand.vmem [shape: f32[2,1], index: 5, kind: output, shape index: {}]  }
   0x1   :  { %v54_v0 = vld [vmem:[%s542_s1 + $0xf8] sm:$0xff]  ;;  %v53_v2 = vld [vmem:[%s542_s1 + $0xf0] sm:$0xff]  ;;  %298 = vmatprep.subr.mxu1 %v337_v3  ;;  %v52_v5 = vld [vmem:[%s542_s1 + $0xe8] sm:$0xff]  ;;  %330 = vmatprep.mubr.msk.f32.mxu1 %vm338_vm0, %v337_v3  ;;  %v10_v51 = vstv %s545_s4 }
   0x2   :  { %v38_v1 = vld [vmem:[%s542_s1 + $0x78] sm:$0xff]  ;;  %246 = vmatprep.subr.mxu0 %v54_v0  ;;  %v37_v4 = vld [vmem:[%s542_s1 + $0x70] sm:$0xff]  ;;  %v36_v6 = vld [vmem:[%s542_s1 + $0x68] sm:$0xff]  ;;  %11 = vst [vmem:[#allocation2] sm:$0x1] %v10_v51 }
   0x3   :  { %247 = vmatpush3.msra.mxu0 %v38_v1  ;;  %v51_v7 = vld [vmem:[%s542_s1 + $0xe0] sm:$0xff]  ;;  %v50_v9 = vld [vmem:[%s542_s1 + $0xd8] sm:$0xff]  ;;  %v49_v11 = vld [vmem:[%s542_s1 + $0xd0] sm:$0xff] }
   0x4   :  { %248 = vmatprep.subr.mxu0 %v53_v2  ;;  %v35_v8 = vld [vmem:[%s542_s1 + $0x60] sm:$0xff]  ;;  %v34_v10 = vld [vmem:[%s542_s1 + $0x58] sm:$0xff]  ;;  %v33_v12 = vld [vmem:[%s542_s1 + $0x50] sm:$0xff] }
   0x5   :  { %249 = vmatpush3.msra.mxu0 %v37_v4  ;;  %v48_v13 = vld [vmem:[%s542_s1 + $0xc8] sm:$0xff]  ;;  %v244_v14 = vld.sshfl [vmem:[%s543_s0] sm:$0x33 pattern:$0x76325410]  ;;  %v159_v17 = vld [vmem:[%s544_s3 + $0x78] sm:$0xff] }
   0x6   :  { %250 = vmatprep.subr.mxu0 %v52_v5  ;;  %v32_v15 = vld [vmem:[%s542_s1 + $0x48] sm:$0xff]  ;;  %v70_v16 = vcombine.high %v244_v14, %v244_v14  ;;  %v47_v18 = vld [vmem:[%s542_s1 + $0xc0] sm:$0xff]  ;;  %299 = vmatpush3.msra.mxu1 %v159_v17  ;;  %v158_v19 = vld [vmem:[%s544_s3 + $0x70] sm:$0xff] }
   0x7   :  { %251 = vmatpush3.msra.mxu0 %v36_v6  ;;  %v31_v20 = vld [vmem:[%s542_s1 + $0x40] sm:$0xff]  ;;  %v46_v21 = vld [vmem:[%s542_s1 + $0xb8] sm:$0xff]  ;;  %300 = vmatprep.subr.mxu1 %v337_v3  ;;  %v157_v22 = vld [vmem:[%s544_s3 + $0x68] sm:$0xff] }
   0x8   :  { %252 = vmatprep.subr.mxu0 %v51_v7  ;;  %137 = vmatprep.mubr.f32.mxu0 %v70_v16  ;;  %v30_v23 = vld [vmem:[%s542_s1 + $0x38] sm:$0xff]  ;;  %v45_v24 = vld [vmem:[%s542_s1 + $0xb0] sm:$0xff]  ;;  %v156_v25 = vld [vmem:[%s544_s3 + $0x60] sm:$0xff] }
   0x9   :  { %253 = vmatpush3.msra.mxu0 %v35_v8  ;;  %301 = vmatpush3.msra.mxu1 %v158_v19  ;;  %v29_v26 = vld [vmem:[%s542_s1 + $0x30] sm:$0xff]  ;;  %v44_v27 = vld [vmem:[%s542_s1 + $0xa8] sm:$0xff]  ;;  %v155_v28 = vld [vmem:[%s544_s3 + $0x58] sm:$0xff] }
   0xa   :  { %254 = vmatprep.subr.mxu0 %v50_v9  ;;  %302 = vmatprep.subr.mxu1 %v337_v3  ;;  %v28_v29 = vld [vmem:[%s542_s1 + $0x28] sm:$0xff]  ;;  %v43_v30 = vld [vmem:[%s542_s1 + $0xa0] sm:$0xff]  ;;  %v42_v32 = vld [vmem:[%s542_s1 + $0x98] sm:$0xff] }
   0xb   :  { %255 = vmatpush3.msra.mxu0 %v34_v10  ;;  %303 = vmatpush3.msra.mxu1 %v157_v22  ;;  %v27_v31 = vld [vmem:[%s542_s1 + $0x20] sm:$0xff]  ;;  %v26_v33 = vld [vmem:[%s542_s1 + $0x18] sm:$0xff]  ;;  %v41_v34 = vld [vmem:[%s542_s1 + $0x90] sm:$0xff] }
   0xc   :  { %256 = vmatprep.subr.mxu0 %v49_v11  ;;  %304 = vmatprep.subr.mxu1 %v337_v3  ;;  %v25_v35 = vld [vmem:[%s542_s1 + $0x10] sm:$0xff]  ;;  %v40_v36 = vld [vmem:[%s542_s1 + $0x88] sm:$0xff]  ;;  %v39_v38 = vld [vmem:[%s542_s1 + $0x80] sm:$0xff] }
   0xd   :  { %257 = vmatpush3.msra.mxu0 %v33_v12  ;;  %305 = vmatpush3.msra.mxu1 %v156_v25  ;;  %v24_v37 = vld [vmem:[%s542_s1 + $0x8] sm:$0xff]  ;;  %v23_v39 = vld [vmem:[%s542_s1] sm:$0xff]  ;;  %v154_v40 = vld [vmem:[%s544_s3 + $0x50] sm:$0xff] }
   0xe   :  { %258 = vmatprep.subr.mxu0 %v48_v13  ;;  %306 = vmatprep.subr.mxu1 %v337_v3  ;;  %v153_v41 = vld [vmem:[%s544_s3 + $0x48] sm:$0xff]  ;;  %v152_v42 = vld [vmem:[%s544_s3 + $0x40] sm:$0xff]  ;;  %v151_v43 = vld [vmem:[%s544_s3 + $0x38] sm:$0xff] }
   0xf   :  { %259 = vmatpush3.msra.mxu0 %v32_v15  ;;  %307 = vmatpush3.msra.mxu1 %v155_v28  ;;  %v150_v44 = vld [vmem:[%s544_s3 + $0x30] sm:$0xff]  ;;  %v149_v45 = vld [vmem:[%s544_s3 + $0x28] sm:$0xff]  ;;  %v148_v46 = vld [vmem:[%s544_s3 + $0x20] sm:$0xff] }
  0x10   :  { %260 = vmatprep.subr.mxu0 %v47_v18  ;;  %308 = vmatprep.subr.mxu1 %v337_v3  ;;  %v147_v47 = vld [vmem:[%s544_s3 + $0x18] sm:$0xff]  ;;  %v146_v48 = vld [vmem:[%s544_s3 + $0x10] sm:$0xff]  ;;  %v145_v49 = vld [vmem:[%s544_s3 + $0x8] sm:$0xff] }
  0x11   :  { %261 = vmatpush3.msra.mxu0 %v31_v20  ;;  %309 = vmatpush3.msra.mxu1 %v154_v40  ;;  %v144_v50 = vld [vmem:[%s544_s3] sm:$0xff] }
  0x12   :  { %262 = vmatprep.subr.mxu0 %v46_v21  ;;  %310 = vmatprep.subr.mxu1 %v337_v3  ;;  %v243_v53 = vld [vmem:[%s546_s2] ss:$0 sm:$0xff] }
  0x13   :  { %263 = vmatpush3.msra.mxu0 %v30_v23  ;;  %311 = vmatpush3.msra.mxu1 %v153_v41  ;;  %v245_v58 = vld [vmem:[#allocation2] ss:$0 sm:$0xff] }
  0x14   :  { %264 = vmatprep.subr.mxu0 %v45_v24  ;;  %312 = vmatprep.subr.mxu1 %v337_v3 }
  0x15   :  { %265 = vmatpush3.msra.mxu0 %v29_v26  ;;  %313 = vmatpush3.msra.mxu1 %v152_v42 }
  0x16   :  { %266 = vmatprep.subr.mxu0 %v44_v27  ;;  %314 = vmatprep.subr.mxu1 %v337_v3 }
  0x17   :  { %267 = vmatpush3.msra.mxu0 %v28_v29  ;;  %315 = vmatpush3.msra.mxu1 %v151_v43 }
  0x18   :  { %268 = vmatprep.subr.mxu0 %v43_v30  ;;  %316 = vmatprep.subr.mxu1 %v337_v3 }
  0x19   :  { %269 = vmatpush3.msra.mxu0 %v27_v31  ;;  %317 = vmatpush3.msra.mxu1 %v150_v44 }
  0x1a   :  { %270 = vmatprep.subr.mxu0 %v42_v32  ;;  %318 = vmatprep.subr.mxu1 %v337_v3 }
  0x1b   :  { %271 = vmatpush3.msra.mxu0 %v26_v33  ;;  %319 = vmatpush3.msra.mxu1 %v149_v45 }
  0x1c   :  { %272 = vmatprep.subr.mxu0 %v41_v34  ;;  %320 = vmatprep.subr.mxu1 %v337_v3 }
  0x1d   :  { %273 = vmatpush3.msra.mxu0 %v25_v35  ;;  %321 = vmatpush3.msra.mxu1 %v148_v46 }
  0x1e   :  { %274 = vmatprep.subr.mxu0 %v40_v36  ;;  %322 = vmatprep.subr.mxu1 %v337_v3 }
  0x1f   :  { %275 = vmatpush3.msra.mxu0 %v24_v37  ;;  %323 = vmatpush3.msra.mxu1 %v147_v47 }
  0x20   :  { %276 = vmatprep.subr.mxu0 %v39_v38  ;;  %324 = vmatprep.subr.mxu1 %v337_v3 }
  0x21   :  { %277 = vmatpush3.msra.mxu0 %v23_v39  ;;  %325 = vmatpush3.msra.mxu1 %v146_v48 }
  0x22   :  { %138 = vmatmul.mubr.f32.vlgmr.msra.gmra.mxu0 %v244_v14  ;;  %326 = vmatprep.subr.mxu1 %v337_v3 }
  0x23   :  { %327 = vmatpush3.msra.mxu1 %v145_v49 }
  0x24   :  { %328 = vmatprep.subr.mxu1 %v337_v3 }
  0x25   :  { %329 = vmatpush3.msra.mxu1 %v144_v50 }
  0xe2   :  { %v278_v52 = vpop.f32.mrf.mxu0 }
  0xe4   :  { %v279_v54 = vpop.f32.mrf.mxu0 }
  0xe5   :  { %v280_v55 = vadd.f32 %v279_v54, %v278_v52 }
  0xe7   :  { %v140_v56 = vadd.f32 %v280_v55, %v243_v53 }
  0xe9   :  { %335 = vtanh.f32 %v140_v56 }
  0xf6   :  { %v336_v57 = vpop.eup %335 }
  0xf7   :  { %331 = vmatmul.mubr.f32.vlgmr.msra.gmra.mxu1 %v336_v57 }
 0x1b7   :  { %v233_v59 = vpop.f32.mrf.mxu1 }
 0x1b8   :  { %v234_v60 = vadd.f32 %v245_v58, %v233_v59 }
 0x1b9   :  { %v332_v61 = vpop.f32.mrf.mxu1 }
 0x1ba   :  { %238 = vst.msk [vmem:[%s547_s5] sm:$0x3] %vm237_vm1, %v234_v60 }

// kernel: palm_forward.2
= control target key start
LH: loop header
LB: loop body
LE: loop exit
PB: predicated region body
PF: predicated region fallthrough
CT: control target
= control target key end

     0   :  { %s4443_s0 = inlined_call_operand.vmem [shape: f32[16,128], index: 0, kind: input, shape index: {}]   ;;  %s4444_s1 = inlined_call_operand.vmem [shape: f32[16,16], index: 1, kind: input, shape index: {}]   ;;  %s4445_s2 = inlined_call_operand.vmem [shape: f32[16,32], index: 2, kind: input, shape index: {}]   ;;  %s4446_s3 = inlined_call_operand.vmem [shape: f32[16,32], index: 3, kind: input, shape index: {}]   ;;  %s4447_s4 = inlined_call_operand.vmem [shape: f32[2,16], index: 4, kind: input, shape index: {}]   ;;  %s4448_s5 = inlined_call_operand.vmem [shape: f32[2,1,128], index: 5, kind: input, shape index: {}, may-alias: {5,11}]   ;;  %s4449_s6 = inlined_call_operand.vmem [shape: f32[2,1,128], index: 6, kind: input, shape index: {}, may-alias: {6,10,12,16}]   ;;  %s4450_s7 = inlined_call_operand.hbm [shape: f32[2,128,384], index: 7, kind: input, shape index: {}]   ;;  %s4451_s8 = inlined_call_operand.vmem [shape: f32[2,1,384], index: 8, kind: input, shape index: {}]   ;;  %s4452_s9 = inlined_call_operand.vmem [shape: f32[2,128,128], index: 9, kind: input, shape index: {}]   ;;  %s4453_s10 = inlined_call_operand.vmem [shape: f32[2,1,128], index: 10, kind: input, shape index: {}, may-alias: {6,10,12,16}]   ;;  %s4454_s11 = inlined_call_operand.vmem [shape: f32[2,1,128], index: 11, kind: input, shape index: {}, may-alias: {5,11}]   ;;  %s4455_s12 = inlined_call_operand.vmem [shape: f32[2,1,128], index: 12, kind: input, shape index: {}, may-alias: {6,10,12,16}]   ;;  %s4456_s13 = inlined_call_operand.hbm [shape: f32[2,128,256], index: 13, kind: input, shape index: {}]   ;;  %s4457_s14 = inlined_call_operand.vmem [shape: f32[2,1,256], index: 14, kind: input, shape index: {}]   ;;  %s4458_s15 = inlined_call_operand.hbm [shape: f32[2,256,128], index: 15, kind: input, shape index: {}]   ;;  %s4459_s16 = inlined_call_operand.vmem [shape: f32[2,1,128], index: 16, kind: input, shape index: {}, may-alias: {6,10,12,16}]   ;;  %s4460_s17 = inlined_call_operand.vmem [shape: f32[1,128], index: 17, kind: input, shape index: {}]   ;;  %s4461_s18 = inlined_call_operand.vmem [shape: f32[1,128], index: 18, kind: input, shape index: {}]   ;;  %s4462_s19 = inlined_call_operand.vmem [shape: f32[2,128], index: 19, kind: output, shape index: {}]  }
   0x1   :  { %4473 = sst [smem:[#allocation13_spill]] %s4443_s0 }
   0x2   :  { %4474 = sst [smem:[#allocation14_spill]] %s4444_s1 }
   0x3   :  { %4475 = sst [smem:[#allocation15_spill]] %s4445_s2 }
   0x4   :  { %4476 = sst [smem:[#allocation16_spill]] %s4446_s3 }
   0x5   :  { %4477 = sst [smem:[#allocation17_spill]] %s4447_s4 }
   0x6   :  { %4478 = sst [smem:[#allocation18_spill]] %s4450_s7 }
   0x7   :  { %4479 = sst [smem:[#allocation19_spill]] %s4452_s9 }
   0x8   :  { %4480 = sst [smem:[#allocation20_spill]] %s4456_s13 }
   0x9   :  { %4481 = sst [smem:[#allocation21_spill]] %s4457_s14 }
   0xa   :  { %4482 = sst [smem:[#allocation22_spill]] %s4458_s15 }
   0xb   :  { %4483 = sst [smem:[#allocation23_spill]] %s4459_s16 }
   0xc   :  { %4484 = sst [smem:[#allocation24_spill]] %s4460_s17 }
   0xd   :  { %4485 = sst [smem:[#allocation25_spill]] %s4461_s18 }
   0xe   :  { %4486 = sst [smem:[#allocation26_spill]] %s4462_s19 }
   0xf   :  { %24 = vsyncpa [#allocation4], 0 }
  0x10   :  { %26 = vsyncpa [#allocation4 + $0x1], 0 }
  0x11   :  { %27 = vsyncpa [#allocation6], 0 }
  0x12   :  { %29 = vsyncpa [#allocation6 + $0x1], 0  ;;  %s3650_s0 = smov 0   ;;  %s3652_s30 = smov 0  }
  0x13   :  { %s3654_s20 = smov 0   ;;  %s3656_s21 = smov 0  }
  0x14 LB: > { %4487 = sst [smem:[#allocation10_spill]] %s3524_s20  ;;  %s3669_s1 = sadd.s32 4294967295, %s3528_s21   ;;  %s3528_s21 = sphi %s3656_s21, %s4516_s21   ;;  %s3524_s20 = sphi %s3654_s20, %s4518_s20   ;;  %s3520_s30 = sphi %s3652_s30, %s4520_s30   ;;  %s3516_s0 = sphi %s3650_s0, %s4519_s0  }
  0x15   : > { %s3672_s22 = sadd.s32 1, %s3528_s21   ;;  %s199_s23 = sadd.s32 1, %s3524_s20 }
  0x16   : > { %4488 = sst [smem:[#allocation11_spill]] %s3672_s22  ;;  %s196_s2 = ssub.s32 %s3528_s21, %s3672_s22 }
  0x17   : > { %p197_p0 = scmp.eq.s32.totalorder %s196_s2, 0  ;;  %p206_p1 = scmp.ne.s32.totalorder %s3524_s20, %s3520_s30 }
  0x18   : > { %p207_p2 = scmp.eq.s32.totalorder %s3528_s21, 0  ;;  %p212_p3 = scmp.ne.s32.totalorder %s3520_s30, %s3516_s0 }
  0x19   : > { %s3682_s24 = scalar_select %p197_p0, %s3524_s20, %s199_s23  }
  0x1a   : > { %p208_p4 = por %p207_p2, %p206_p1  ;;  %p213_p5 = scmp.eq.s32.totalorder %s3669_s1, 0 }
  0x1b   : > { %4489 = sst [smem:[#allocation12_spill]] %s3682_s24  ;;  %p3279_p6 = scmp.lt.s32.totalorder %s3528_s21, 2 }
  0x1c   : > { %p3686_p7 = por %p213_p5, %p212_p3  ;;  %s3691_s3 = sand.u32 1, %s3524_s20  }
  0x1d   : > { %p3693_p8 = pnand %p3279_p6, %p208_p4  ;;  %s620_s27 = sand.u32 1, %s3528_s21  }
  0x1e   : > { %s4490_s25 = scalar_select %p3686_p7, 1, 0 }
  0x1f   : > { %s4470_s28 = sshll.u32 %s3691_s3, 8  ;;  %s4471_s29 = sshll.u32 %s3528_s21, 12 }
  0x20   : > { %s624_s0 = scalar_lea.vmem [#allocation5], %s4470_s28  ;;  %s4492_s13 = sld [smem:[#allocation20_spill]] }
  0x21   : > { %s631_s2 = sshll.u32 %s624_s0, 4  ;;  %s3711_s20 = scalar_lea.sflag [#allocation6], %s620_s27  ;;  %s3709_s2 = int_to_ptr.vmem [resolvable:$true] %s631_s2 }
  0x22   : > { %p3717_p10 = pneg %p3693_p8 }
  0x26   : > { %s3707_s22 = scalar_lea.hbm %s4492_s13, %s4471_s29  ;;  %s3411_s23 = scalar_lea.hbm %s4492_s13, 8192 }
  0x27   : > { %s3406_s19 = scalar_lea.hbm %s3707_s22, 4096  ;;  %p3412_p13 = scmp.lt.s32.totalorder %s3707_s22, %s4492_s13 }
  0x28   : > { %p3407_p9 = scmp.ne.s32.totalorder %s3707_s22, %s3406_s19  ;;  %p3413_p0 = scmp.lt.s32.totalorder %s3411_s23, %s3406_s19 }
  0x2a   : > { %p3409_p11 = pnand %p3717_p10, %p3407_p9  ;;  %p3414_p1 = por %p3413_p0, %p3412_p13 }
  0x2c   : > { %p3410_p12 = pneg %p3409_p11 }
  0x2e   : > { %p3415_p2 = pnand %p3414_p1, %p3410_p12 }
  0x30   : > { %3418 = shalt.err (!%p3415_p2)
}
  0x31   : > { %s3419_s27 = scalar_lea.vmem %s3709_s2, 4096  ;;  %s3530_s18 = smov [#allocation5]  }
  0x32   : > { %p3420_p3 = scmp.ne.s32.totalorder %s3709_s2, %s3419_s27  ;;  %s3424_s24 = sshll.u32 %s3530_s18, 4  ;;  %s3425_s24 = int_to_ptr.vmem [resolvable:$false] %s3424_s24 }
  0x33   : > { %s3426_s0 = scalar_lea.vmem %s3425_s24, 8192  ;;  %p3427_p6 = scmp.lt.s32.totalorder %s3709_s2, %s3425_s24 }
  0x34   : > { %p3422_p4 = pnand %p3420_p3, %p3717_p10  ;;  %p3428_p9 = scmp.lt.s32.totalorder %s3426_s0, %s3419_s27 }
  0x36   : > { %p3423_p5 = pneg %p3422_p4  ;;  %p3429_p11 = por %p3428_p9, %p3427_p6 }
  0x38   : > { %p3430_p7 = pnand %p3429_p11, %p3423_p5 }
  0x3a   : > { %3433 = shalt.err (!%p3430_p7)
}
  0x3b   : > { %s3531_s19 = smov 256   ;;  %s3532_s18 = smov 16  }
  0x3c   : > { %3275 = dma.hbm_to_vmem [thread:$0]  (!%p3693_p8), %s3707_s22, 4096, %s3709_s2, %s3711_s20, %s3531_s19, %s3531_s19, %s3532_s18  }
  0x3d   : > { %s4494_s28 = sshll.u32 %s3528_s21, 12  ;;  %s4495_s15 = sld [smem:[#allocation22_spill]] }
  0x3e   : > { %s4496_s24 = sshll.u32 %s3691_s3, 8  ;;  %p2971_p7 = scmp.ge.s32.totalorder %s3528_s21, 1 }
  0x3f   : > { %s652_s0 = scalar_lea.vmem [#allocation7], %s4496_s24  ;;  %p673_p12 = scmp.lt.s32.totalorder %s3528_s21, 3 }
  0x40   : > { %s659_s13 = sshll.u32 %s652_s0, 4  ;;  %s3259_s17 = smul.u32 384, %s3691_s3  ;;  %s3750_s13 = int_to_ptr.vmem [resolvable:$true] %s659_s13 }
  0x41   : > { %p3754_p13 = pnand %p2971_p7, %p673_p12  ;;  %s3260_s22 = smul.u32 6144, %s3528_s21 }
  0x42   : > { %s4498_s7 = sld [smem:[#allocation18_spill]]  ;;  %s567_s23 = scalar_lea.sflag [#allocation4], %s3691_s3 }
  0x43   : > { %s3745_s27 = scalar_lea.hbm %s4495_s15, %s4494_s28  ;;  %s570_s28 = scalar_lea.vmem [#allocation3], %s3259_s17 }
  0x44   : > { %s4497_s16 = scalar_select %p3754_p13, 1, 0 }
  0x45   : > { %s577_s29 = sshll.u32 %s570_s28, 4  ;;  %s3764_s29 = int_to_ptr.vmem [resolvable:$true] %s577_s29 }
  0x48   : > { %s3762_s18 = scalar_lea.hbm %s4498_s7, %s3260_s22  ;;  %s3439_s14 = scalar_lea.hbm %s4498_s7, 12288 }
  0x49   : > { %s3434_s24 = scalar_lea.hbm %s3762_s18, 6144  ;;  %p3440_p3 = scmp.lt.s32.totalorder %s3762_s18, %s4498_s7 }
  0x4a   : > { %p3435_p0 = scmp.ne.s32.totalorder %s3762_s18, %s3434_s24  ;;  %p3441_p4 = scmp.lt.s32.totalorder %s3439_s14, %s3434_s24 }
  0x4c   : > { %p3437_p1 = pnand %p3435_p0, %p3717_p10  ;;  %p3442_p5 = por %p3441_p4, %p3440_p3 }
  0x4e   : > { %p3438_p2 = pneg %p3437_p1 }
  0x50   : > { %p3443_p6 = pnand %p3442_p5, %p3438_p2 }
  0x52   : > { %3446 = shalt.err (!%p3443_p6)
}
  0x53   : > { %s3447_s17 = scalar_lea.vmem %s3764_s29, 6144  ;;  %s3533_s19 = smov [#allocation3]  }
  0x54   : > { %p3448_p9 = scmp.ne.s32.totalorder %s3764_s29, %s3447_s17  ;;  %s3452_s28 = sshll.u32 %s3533_s19, 4  ;;  %s3453_s28 = int_to_ptr.vmem [resolvable:$false] %s3452_s28 }
  0x55   : > { %s3454_s0 = scalar_lea.vmem %s3453_s28, 12288  ;;  %p3455_p12 = scmp.lt.s32.totalorder %s3764_s29, %s3453_s28 }
  0x56   : > { %p3450_p11 = pnand %p3448_p9, %p3717_p10  ;;  %p3456_p0 = scmp.lt.s32.totalorder %s3454_s0, %s3447_s17 }
  0x58   : > { %p3451_p7 = pneg %p3450_p11  ;;  %p3457_p1 = por %p3456_p0, %p3455_p12 }
  0x5a   : > { %p3458_p13 = pnand %p3457_p1, %p3451_p7 }
  0x5c   : > { %3461 = shalt.err (!%p3458_p13)
}
  0x5d   : > { %s3534_s14 = smov 384   ;;  %s3535_s24 = smov 24  }
  0x5e   : > { %3272 = dma.hbm_to_vmem [thread:$0]  (!%p3693_p8), %s3762_s18, 6144, %s3764_s29, %s567_s23, %s3534_s14, %s3534_s14, %s3535_s24  }
  0x5f   : > { %s3462_s21 = scalar_lea.hbm %s3745_s27, 4096  ;;  %s3467_s17 = scalar_lea.hbm %s4495_s15, 8192 }
  0x60   : > { %p3463_p2 = scmp.ne.s32.totalorder %s3745_s27, %s3462_s21  ;;  %p3468_p13 = scmp.lt.s32.totalorder %s3745_s27, %s4495_s15 }
  0x61   : > { %p3469_p5 = scmp.lt.s32.totalorder %s3467_s17, %s3462_s21 }
  0x62   : > { %p3465_p3 = pnand %p3463_p2, %p3717_p10 }
  0x63   : > { %p3470_p6 = por %p3469_p5, %p3468_p13 }
  0x64   : > { %p3466_p4 = pneg %p3465_p3 }
  0x66   : > { %p3471_p9 = pnand %p3470_p6, %p3466_p4 }
  0x68   : > { %3474 = shalt.err (!%p3471_p9)
}
  0x69   : > { %s3475_s3 = scalar_lea.vmem %s3750_s13, 4096  ;;  %s3536_s18 = smov [#allocation7]  }
  0x6a   : > { %p3476_p11 = scmp.ne.s32.totalorder %s3750_s13, %s3475_s3  ;;  %s3480_s29 = sshll.u32 %s3536_s18, 4  ;;  %s3481_s29 = int_to_ptr.vmem [resolvable:$false] %s3480_s29 }
  0x6b   : > { %s3482_s23 = scalar_lea.vmem %s3481_s29, 8192  ;;  %p3483_p0 = scmp.lt.s32.totalorder %s3750_s13, %s3481_s29 }
  0x6c   : > { %p3478_p7 = pnand %p3476_p11, %p3717_p10  ;;  %p3484_p1 = scmp.lt.s32.totalorder %s3482_s23, %s3475_s3 }
  0x6e   : > { %p3479_p12 = pneg %p3478_p7  ;;  %p3485_p2 = por %p3484_p1, %p3483_p0 }
  0x70   : > { %p3486_p3 = pnand %p3485_p2, %p3479_p12 }
  0x72   : > { %3489 = shalt.err (!%p3486_p3)
}
  0x73   : > { %s3537_s0 = smov 128   ;;  %s3538_s14 = smov 8  }
  0x74   : > { %3278 = dma.hbm_to_vmem [thread:$0]  (!%p3693_p8), %s3745_s27, 4096, %s3750_s13, %s3711_s20, %s3537_s0, %s3537_s0, %s3538_s14  }
  0x75   : > { %p4499_p10 = scmp.ne.s32.totalorder %s4497_s16, 0 }
  0x76   : > { %s679_s4 = sand.u32 (!%p4499_p10), 1, %s3520_s30   ;;  %p4500_p4 = scmp.ne.s32.totalorder (!%p4499_p10), %s4490_s25, 0 }
  0x77   : > { %677 = sbr.rel (%p4499_p10) target bundleno = 4241 (0x1091), region = 96  ;;  %s680_s21 = scalar_lea.sflag (!%p4499_p10), [#allocation4], %s679_s4 }
  0x78   : > { %s3261_s24 = smul.u32 (!%p4499_p10), 384, %s679_s4 }
  0x7a   : > { %s3813_s2 = scalar_lea.vmem (!%p4499_p10), [#allocation3], %s3261_s24 }
  0x7c   : > { %3507 = dma.done.wait (%p4500_p4), %s680_s21, 6144  }
  0x7d   : > { %3509 = vsyncadd (%p4500_p4), %s680_s21, 4294961152  ;;  %s688_s22 = sand.u32 1, %s3669_s1   ;;  %s2972_s26 = sshll.u32 %s679_s4, 8 }
  0x7e   : > { %s689_s13 = scalar_lea.sflag [#allocation6], %s688_s22  ;;  %s3820_s20 = scalar_lea.vmem [#allocation5], %s2972_s26 }
  0x7f   : > { %3511 = dma.done.wait (%p4500_p4), %s689_s13, 8192  }
  0x80   : > { %3513 = vsyncadd (%p4500_p4), %s689_s13, 4294959104  ;;  %p792_p8 = scmp.lt.s32.totalorder %s3669_s1, 1  ;;  %s4501_s9 = sld [smem:[#allocation19_spill]] }
  0x81   : > { %s4503_s21 = sld [smem:[#allocation23_spill]]  ;;  %p2977_p13 = scmp.ne.s32.totalorder %s3669_s1, 0 }
  0x82   : > { %s3828_s16 = scalar_select %p792_p8, %s3669_s1, 1 }
  0x83   : > { %s4504_s17 = sld [smem:[#allocation13_spill]] (!%p2977_p13) }
  0x84   : > { %s3262_s18 = smul.u32 3, %s3828_s16  ;;  %s3016_s29 = sshll.u32 %s3828_s16, 7 }
  0x85   : > { %s812_s25 = scalar_lea.vmem %s4454_s11, %s3828_s16  ;;  %s815_s7 = scalar_lea.vmem %s4455_s12, %s3828_s16 }
  0x86   : > { %s3843_s14 = scalar_lea.vmem %s4501_s9, %s3016_s29  ;;  %s3852_s27 = scalar_lea.vmem %s4451_s8, %s3262_s18 }
  0x87   : > { %s2976_s23 = sshll.u32 %s3828_s16, 1  ;;  %s4502_s9 = sld [smem:[#allocation21_spill]] }
  0x88   : > { %s822_s22 = scalar_lea.vmem %s4503_s21, %s3828_s16  ;;  %s3872_s18 = scalar_lea.vmem [#allocation7], %s2972_s26 }
  0x89   : > { %826 = sbr.rel (%p2977_p13) target bundleno = 144 (0x90), region = 112 }
  0x8d   : > { %s3866_s15 = scalar_lea.vmem %s4502_s9, %s2976_s23 }
  0x8e   : > { %v827_v0 = vld [vmem:[%s4504_s17] sm:$0xff]  ;;  %v828_v1 = vld [vmem:[%s4504_s17 + $0x8] sm:$0xff] }
  0x8f   : > { %829 = vst [vmem:[#allocation2] sm:$0xff] %v827_v0  ;;  %830 = vst [vmem:[#allocation2 + $0x8] sm:$0xff] %v828_v1 }
  0x90 PF: > { %v926_v4 = vld [vmem:[%s3813_s2 + $0x170] sm:$0xff]  ;;  %v925_v5 = vld [vmem:[%s3813_s2 + $0x168] sm:$0xff]  ;;  %v923_v6 = vld [vmem:[%s3813_s2 + $0x158] sm:$0xff]  ;;  %v3539_v58 = vmov 0.0   ;;  %s4505_s21 = scalar_lea.vmem %s4448_s5, %s3828_s16  ;;  %s4506_s29 = scalar_lea.vmem %s4449_s6, %s3828_s16  ;;  %vm1117_vm0 = vcmask 130048   ;;  %vm1152_vm1 = vcmask 261120  }
  0x91   : > { %945 = vmatprep.subr.mxu0 %v926_v4  ;;  %v922_v7 = vld [vmem:[%s3813_s2 + $0x150] sm:$0xff]  ;;  %v927_v8 = vld [vmem:[%s3813_s2 + $0x178] sm:$0xff]  ;;  %v920_v9 = vld [vmem:[%s3813_s2 + $0x140] sm:$0xff]  ;;  %1009 = vmatprep.mubr.f32.mxu0 %v3539_v58  ;;  %s3540_s0 = smov 16   ;;  %s3542_s4 = smov 80   ;;  %vm2177_vm2 = vcmask 523264  }
  0x92   : > { %946 = vmatpush1.msra.mxu0 %v925_v5  ;;  %3126 = vmatprep.subr.mxu1 %v927_v8  ;;  %v924_v10 = vld [vmem:[%s3813_s2 + $0x160] sm:$0xff]  ;;  %v919_v11 = vld [vmem:[%s3813_s2 + $0x138] sm:$0xff]  ;;  %v917_v12 = vld [vmem:[%s3813_s2 + $0x128] sm:$0xff]  ;;  %s3543_s24 = smov 48   ;;  %s4507_s3 = sld [smem:[#allocation16_spill]]  ;;  %vm2180_vm3 = vcmask 785408  }
  0x93   : > { %947 = vmatprep.subr.mxu0 %v923_v6  ;;  %3127 = vmatpush3.msra.mxu1 %v927_v8  ;;  %v916_v13 = vld [vmem:[%s3813_s2 + $0x120] sm:$0xff]  ;;  %v914_v22 = vld [vmem:[%s3813_s2 + $0x110] sm:$0xff]  ;;  %v921_v23 = vld [vmem:[%s3813_s2 + $0x148] sm:$0xff]  ;;  %s4509_s13 = sld [smem:[#allocation14_spill]]  ;;  %s3544_s26 = smov 32  }
  0x94   : > { %948 = vmatpush1.msra.mxu0 %v922_v7  ;;  %3128 = vmatprep.subr.mxu1 %v924_v10  ;;  %v913_v24 = vld [vmem:[%s3813_s2 + $0x108] sm:$0xff]  ;;  %v911_v25 = vld [vmem:[%s3813_s2 + $0xf8] sm:$0xff]  ;;  %v918_v26 = vld [vmem:[%s3813_s2 + $0x130] sm:$0xff]  ;;  %p3008_p5 = scmp.ne.s32.totalorder %s3669_s1, 1 }
  0x95   : > { %949 = vmatprep.subr.mxu0 %v920_v9  ;;  %3129 = vmatpush3.msra.mxu1 %v924_v10  ;;  %v910_v27 = vld [vmem:[%s3813_s2 + $0xf0] sm:$0xff]  ;;  %v908_v28 = vld [vmem:[%s3813_s2 + $0xe0] sm:$0xff]  ;;  %v915_v29 = vld [vmem:[%s3813_s2 + $0x118] sm:$0xff]  ;;  %s4513_s28 = sld [smem:[#allocation25_spill]] (!%p3008_p5) }
  0x96   : > { %v831_v2 = vld [vmem:[#allocation2] sm:$0xff]  ;;  %v832_v3 = vld [vmem:[#allocation2 + $0x8] sm:$0xff]  ;;  %950 = vmatpush1.msra.mxu0 %v919_v11  ;;  %3130 = vmatprep.subr.mxu1 %v921_v23  ;;  %v905_v31 = vld [vmem:[%s3813_s2 + $0xc8] sm:$0xff] }
  0x97   : > { %841 = vadd.xlane.f32.xlu0 %v831_v2  ;;  %951 = vmatprep.subr.mxu0 %v917_v12  ;;  %v907_v30 = vld [vmem:[%s3813_s2 + $0xd8] sm:$0xff]  ;;  %v912_v32 = vld [vmem:[%s3813_s2 + $0x100] sm:$0xff]  ;;  %v902_v34 = vld [vmem:[%s3813_s2 + $0xb0] sm:$0xff] }
  0x98   : > { %952 = vmatpush1.msra.mxu0 %v916_v13  ;;  %3131 = vmatpush3.msra.mxu1 %v921_v23  ;;  %v904_v33 = vld [vmem:[%s3813_s2 + $0xc0] sm:$0xff]  ;;  %v909_v35 = vld [vmem:[%s3813_s2 + $0xe8] sm:$0xff]  ;;  %v899_v37 = vld [vmem:[%s3813_s2 + $0x98] sm:$0xff]  ;;  %v930_v13 = vlaneseq }
  0x99   : > { %953 = vmatprep.subr.mxu0 %v914_v22  ;;  %3132 = vmatprep.subr.mxu1 %v918_v26  ;;  %v901_v36 = vld [vmem:[%s3813_s2 + $0xa8] sm:$0xff]  ;;  %v906_v38 = vld [vmem:[%s3813_s2 + $0xd0] sm:$0xff]  ;;  %v896_v40 = vld [vmem:[%s3813_s2 + $0x80] sm:$0xff] }
  0x9a   : > { %954 = vmatpush1.msra.mxu0 %v913_v24  ;;  %3133 = vmatpush3.msra.mxu1 %v918_v26  ;;  %v898_v39 = vld [vmem:[%s3813_s2 + $0x90] sm:$0xff]  ;;  %v903_v41 = vld [vmem:[%s3813_s2 + $0xb8] sm:$0xff]  ;;  %v893_v43 = vld [vmem:[%s3813_s2 + $0x68] sm:$0xff] }
  0x9b   : > { %843 = vadd.xlane.f32.xlu0 %v832_v3  ;;  %955 = vmatprep.subr.mxu0 %v911_v25  ;;  %v895_v42 = vld [vmem:[%s3813_s2 + $0x78] sm:$0xff]  ;;  %v900_v44 = vld [vmem:[%s3813_s2 + $0xa0] sm:$0xff]  ;;  %v890_v46 = vld [vmem:[%s3813_s2 + $0x50] sm:$0xff] }
  0x9c   : > { %956 = vmatpush1.msra.mxu0 %v910_v27  ;;  %3134 = vmatprep.subr.mxu1 %v915_v29  ;;  %v892_v45 = vld [vmem:[%s3813_s2 + $0x60] sm:$0xff]  ;;  %v897_v47 = vld [vmem:[%s3813_s2 + $0x88] sm:$0xff]  ;;  %v887_v49 = vld [vmem:[%s3813_s2 + $0x38] sm:$0xff] }
  0x9d   : > { %957 = vmatprep.subr.mxu0 %v908_v28  ;;  %3135 = vmatpush3.msra.mxu1 %v915_v29  ;;  %v889_v48 = vld [vmem:[%s3813_s2 + $0x48] sm:$0xff]  ;;  %v894_v50 = vld [vmem:[%s3813_s2 + $0x70] sm:$0xff]  ;;  %v884_v52 = vld [vmem:[%s3813_s2 + $0x20] sm:$0xff] }
  0x9e   : > { %958 = vmatpush1.msra.mxu0 %v907_v30  ;;  %3136 = vmatprep.subr.mxu1 %v912_v32  ;;  %v886_v51 = vld [vmem:[%s3813_s2 + $0x30] sm:$0xff]  ;;  %v891_v53 = vld [vmem:[%s3813_s2 + $0x58] sm:$0xff]  ;;  %v881_v55 = vld [vmem:[%s3813_s2 + $0x8] sm:$0xff] }
  0x9f   : > { %959 = vmatprep.subr.mxu0 %v905_v31  ;;  %3137 = vmatpush3.msra.mxu1 %v912_v32  ;;  %v883_v54 = vld [vmem:[%s3813_s2 + $0x18] sm:$0xff]  ;;  %v888_v56 = vld [vmem:[%s3813_s2 + $0x40] sm:$0xff]  ;;  %v885_v59 = vld [vmem:[%s3813_s2 + $0x28] sm:$0xff] }
  0xa0   : > { %960 = vmatpush1.msra.mxu0 %v904_v33  ;;  %3138 = vmatprep.subr.mxu1 %v909_v35  ;;  %v880_v57 = vld [vmem:[%s3813_s2] sm:$0xff]  ;;  %v882_v60 = vld [vmem:[%s3813_s2 + $0x10] sm:$0xff]  ;;  %s4508_s2 = sld [smem:[#allocation15_spill]] }
  0xa1   : > { %961 = vmatprep.subr.mxu0 %v902_v34  ;;  %3139 = vmatpush3.msra.mxu1 %v909_v35  ;;  %v2978_v4 = vld [vmem:[%s4505_s21] ss:$0 sm:$0xff]  ;;  %s3546_s21 = smov 96  }
  0xa2   : > { %962 = vmatpush1.msra.mxu0 %v901_v36  ;;  %3140 = vmatprep.subr.mxu1 %v906_v38  ;;  %v2979_v6 = vld [vmem:[%s4506_s29] ss:$0 sm:$0xff] }
  0xa3   : > { %963 = vmatprep.subr.mxu0 %v899_v37  ;;  %3141 = vmatpush3.msra.mxu1 %v906_v38  ;;  %v4023_v35 = vld [vmem:[%s4507_s3] sm:$0xff]  ;;  %v4029_v37 = vld [vmem:[%s4507_s3 + $0x8] sm:$0xff] }
  0xa4   : > { %964 = vmatpush1.msra.mxu0 %v898_v39  ;;  %3142 = vmatprep.subr.mxu1 %v903_v41 }
  0xa5   : > { %965 = vmatprep.subr.mxu0 %v896_v40  ;;  %3143 = vmatpush3.msra.mxu1 %v903_v41 }
  0xa6   : > { %966 = vmatpush1.msra.mxu0 %v895_v42  ;;  %3144 = vmatprep.subr.mxu1 %v900_v44  ;;  %v4034_v39 = vld [vmem:[%s4508_s2 + $0x8] sm:$0xff] }
  0xa7   : > { %967 = vmatprep.subr.mxu0 %v893_v43  ;;  %3145 = vmatpush3.msra.mxu1 %v900_v44 }
  0xa8   : > { %968 = vmatpush1.msra.mxu0 %v892_v45  ;;  %3146 = vmatprep.subr.mxu1 %v897_v47 }
  0xa9   : > { %969 = vmatprep.subr.mxu0 %v890_v46  ;;  %3147 = vmatpush3.msra.mxu1 %v897_v47  ;;  %v4045_v46 = vld [vmem:[%s4508_s2] sm:$0xff] }
  0xaa   : > { %970 = vmatpush1.msra.mxu0 %v889_v48  ;;  %3148 = vmatprep.subr.mxu1 %v894_v50 }
  0xab   : > { %971 = vmatprep.subr.mxu0 %v887_v49  ;;  %3149 = vmatpush3.msra.mxu1 %v894_v50 }
  0xac   : > { %972 = vmatpush1.msra.mxu0 %v886_v51  ;;  %3150 = vmatprep.subr.mxu1 %v891_v53 }
  0xad   : > { %973 = vmatprep.subr.mxu0 %v884_v52  ;;  %3151 = vmatpush3.msra.mxu1 %v891_v53 }
  0xae   : > { %974 = vmatpush1.msra.mxu0 %v883_v54  ;;  %3152 = vmatprep.subr.mxu1 %v888_v56 }
  0xaf   : > { %975 = vmatprep.subr.mxu0 %v881_v55  ;;  %3153 = vmatpush3.msra.mxu1 %v888_v56 }
  0xb0   : > { %976 = vmatpush1.msra.mxu0 %v880_v57  ;;  %3154 = vmatprep.subr.mxu1 %v885_v59 }
  0xb1   : > { %3155 = vmatpush3.msra.mxu1 %v885_v59 }
  0xb2   : > { %3156 = vmatprep.subr.mxu1 %v882_v60 }
  0xb3   : > { %3157 = vmatpush3.msra.mxu1 %v882_v60 }
 0x120   : > { %v842_v14 = vpop.xlane.xlu0 %841 }
 0x121   : > { %v846_v15 = vmul.f32 0.0078125, %v842_v14  ;;  %v3951_v14 = vshrl.u32 %v930_v13, 7 }
 0x123   : > { %v3891_v16 = vsub.f32 %v831_v2, %v846_v15  ;;  %v936_v15 = vsub.s32 1, %v3951_v14  ;;  %v940_v41 = vsub.s32 2, %v3951_v14 }
 0x124   : > { %v844_v17 = vpop.xlane.xlu0 %843 }
 0x125   : > { %v847_v18 = vmul.f32 0.0078125, %v844_v17  ;;  %v850_v19 = vmul.f32 %v3891_v16, %v3891_v16 }
 0x127   : > { %v3895_v20 = vsub.f32 %v832_v3, %v847_v18  ;;  %852 = vadd.xlane.f32.xlu1 %v850_v19  ;;  %v932_v19 = vsub.s32 0, %v3951_v14 }
 0x129   : > { %v851_v21 = vmul.f32 %v3895_v20, %v3895_v20 }
 0x12b   : > { %854 = vadd.xlane.f32.xlu1 %v851_v21 }
 0x1b0   : > { %v853_v61 = vpop.xlane.xlu1 %852 }
 0x1b1   : > { %v856_v62 = vmul.f32 0.0078125, %v853_v61 }
 0x1b3   : > { %v858_v63 = vadd.f32 1e-05, %v856_v62 }
 0x1b4   : > { %v855_v0 = vpop.xlane.xlu1 %854 }
 0x1b5   : > { %3344 = vrsqrt.f32 %v858_v63  ;;  %v857_v1 = vmul.f32 0.0078125, %v855_v0 }
 0x1b7   : > { %v859_v2 = vadd.f32 1e-05, %v857_v1 }
 0x1b9   : > { %3346 = vrsqrt.f32 %v859_v2 }
 0x1c2   : > { %v3345_v3 = vpop.eup %3344 }
 0x1c3   : > { %v862_v5 = vmul.f32 %v3345_v3, %v3891_v16  ;;  %v3955_v16 = vld [vmem:[%s3852_s27] sm:$0x7]  ;;  %s3541_s27 = smov 112  }
 0x1c4   : > { %v937_v17 = vrot.slane %v3955_v16, %v936_v15  ;;  %v933_v23 = vrot.slane %v3955_v16, %v932_v19  ;;  %v941_v51 = vrot.slane %v3955_v16, %v940_v41 }
 0x1c5   : > { %v870_v7 = vmul.f32 %v2978_v4, %v862_v5 }
 0x1c6   : > { %v3347_v8 = vpop.eup %3346 }
 0x1c7   : > { %v878_v9 = vadd.f32 %v2979_v6, %v870_v7  ;;  %v863_v10 = vmul.f32 %v3347_v8, %v3895_v20  ;;  %v4075_v7 = vld [vmem:[%s4509_s13 + $0x8] sm:$0xff] }
 0x1c9   : > { %1010 = vmatmul.mubr.f32.vlgmr.msra.gmra.mxu0 %v878_v9  ;;  %3158 = vmatprep.mubr.f32.mxu1 %v878_v9  ;;  %v871_v11 = vmul.f32 %v2978_v4, %v863_v10  ;;  %v4080_v10 = vld [vmem:[%s4509_s13] sm:$0xff] }
 0x1ca   : > { %1015 = vmatprep.mubr.f32.mxu0 %v3539_v58 }
 0x1cb   : > { %v879_v12 = vadd.f32 %v2979_v6, %v871_v11 }
 0x1cd   : > { %1016 = vmatmul.mubr.f32.gmra.mxu0 %v879_v12  ;;  %3159 = vmatmul.mubr.f32.vlgmr.msra.gmra.mxu1 %v879_v12 }
 0x289   : > { %v1011_v18 = vpop.f32.mrf.mxu0 }
 0x28a   : > { %v3973_v27 = vadd.f32 %v1011_v18, %v933_v23 }
 0x28b   : > { %v1013_v20 = vpop.f32.mrf.mxu0 }
 0x28c   : > { %v3961_v21 = vadd.f32 %v1013_v20, %v937_v17  ;;  %v3985_v30 = vsub.f32 0.0, %v3973_v27  ;;  %v1097_v53 = vmul.f32 %v3973_v27, %v4045_v46 }
 0x28d   : > { %v1017_v22 = vpop.f32.mrf.mxu0  ;;  %v3160_v55 = vpop.f32.mrf.mxu1 }
 0x28e   : > { %1140 = vrot.lane.b32.xlu1 %v3961_v21, %s3540_s0  ;;  %v3971_v26 = vsub.f32 0.0, %v3961_v21  ;;  %v3980_v29 = vadd.f32 %v1017_v22, %v933_v23  ;;  %v1126_v47 = vmul.f32 %v3961_v21, %v4045_v46  ;;  %v4058_v61 = vadd.f32 %v3160_v55, %v941_v51 }
 0x28f   : > { %v1019_v24 = vpop.f32.mrf.mxu0  ;;  %v1088_v2 = vpop.f32.mrf.mxu1 }
 0x290   : > { %v3968_v25 = vadd.f32 %v1019_v24, %v937_v17  ;;  %v3991_v31 = vsub.f32 0.0, %v3980_v29  ;;  %v1098_v63 = vmul.f32 %v3980_v29, %v4034_v39  ;;  %v4066_v4 = vadd.f32 %v1088_v2, %v941_v51 }
 0x292   : > { %1132 = vrot.lane.b32.xlu1 %v3971_v26, %s3541_s27  ;;  %v3977_v28 = vsub.f32 0.0, %v3968_v25  ;;  %v1127_v43 = vmul.f32 %v3968_v25, %v4034_v39 }
 0x294   : > { %1134 = vrot.lane.b32.xlu0 %v3977_v28, %s3541_s27 }
 0x296   : > { %1142 = vrot.lane.b32.xlu1 %v3968_v25, %s3540_s0 }
 0x298   : > { %1103 = vrot.lane.b32.xlu0 %v3985_v30, %s3541_s27 }
 0x29a   : > { %1111 = vrot.lane.b32.xlu1 %v3973_v27, %s3540_s0 }
 0x29c   : > { %1105 = vrot.lane.b32.xlu0 %v3991_v31, %s3541_s27 }
 0x29e   : > { %1113 = vrot.lane.b32.xlu1 %v3980_v29, %s3540_s0 }
 0x2a0   : > { %1353 = vrot.lane.b32.xlu0 %v3985_v30, %s3542_s4 }
 0x2a2   : > { %1391 = vrot.lane.b32.xlu1 %v3968_v25, %s3541_s27 }
 0x2a4   : > { %1355 = vrot.lane.b32.xlu0 %v3991_v31, %s3542_s4 }
 0x2a6   : > { %1383 = vrot.lane.b32.xlu1 %v3971_v26, %s3542_s4 }
 0x2a8   : > { %1361 = vrot.lane.b32.xlu0 %v3980_v29, %s3541_s27 }
 0x2aa   : > { %1389 = vrot.lane.b32.xlu1 %v3961_v21, %s3541_s27 }
 0x2ac   : > { %1653 = vrot.lane.b32.xlu0 %v3971_v26, %s3543_s24 }
 0x2ae   : > { %1359 = vrot.lane.b32.xlu1 %v3973_v27, %s3541_s27 }
 0x2b0   : > { %1623 = vrot.lane.b32.xlu0 %v3985_v30, %s3543_s24 }
 0x2b2   : > { %1661 = vrot.lane.b32.xlu1 %v3968_v25, %s3542_s4 }
 0x2b4   : > { %1385 = vrot.lane.b32.xlu0 %v3977_v28, %s3542_s4 }
 0x2b6   : > { %1659 = vrot.lane.b32.xlu1 %v3961_v21, %s3542_s4 }
 0x2b8   : > { %1655 = vrot.lane.b32.xlu0 %v3977_v28, %s3543_s24 }
 0x2ba   : > { %1629 = vrot.lane.b32.xlu1 %v3973_v27, %s3542_s4 }
 0x300   : > { %v1141_v32 = vpop.permute.xlu1 %1140 }
 0x304   : > { %v1133_v33 = vpop.permute.xlu1 %1132 }
 0x305   : > { %v1146_v36 = vsel %vm1117_vm0, %v1133_v33, %v1141_v32 }
 0x306   : > { %v1135_v34 = vpop.permute.xlu0 %1134  ;;  %v1148_v42 = vmul.f32 %v1146_v36, %v4023_v35 }
 0x308   : > { %v1143_v38 = vpop.permute.xlu1 %1142  ;;  %v1150_v52 = vadd.f32 %v1148_v42, %v1126_v47 }
 0x309   : > { %v1147_v40 = vsel %vm1117_vm0, %v1135_v34, %v1143_v38 }
 0x30a   : > { %v1149_v44 = vmul.f32 %v1147_v40, %v4029_v37  ;;  %v1104_v45 = vpop.permute.xlu0 %1103 }
 0x30c   : > { %v1151_v48 = vadd.f32 %v1149_v44, %v1127_v43  ;;  %v1112_v49 = vpop.permute.xlu1 %1111 }
 0x30d   : > { %v1118_v50 = vsel %vm1117_vm0, %v1104_v45, %v1112_v49 }
 0x30e   : > { %v1120_v54 = vmul.f32 %v1118_v50, %v4023_v35  ;;  %3161 = vmatprep.subr.msk.mxu1 %vm1152_vm1, %v1151_v48  ;;  %v1106_v57 = vpop.permute.xlu0 %1105 }
 0x30f   : > { %3162 = vmatpush3.xpose.msk.msra.mxu1 %vm1152_vm1, %v1151_v48 }
 0x310   : > { %v1122_v56 = vadd.f32 %v1120_v54, %v1097_v53  ;;  %3163 = vmatprep.subr.msk.mxu1 %vm1152_vm1, %v1150_v52  ;;  %v1114_v59 = vpop.permute.xlu1 %1113 }
 0x311   : > { %v1119_v60 = vsel %vm1117_vm0, %v1106_v57, %v1114_v59 }
 0x312   : > { %v1124_v62 = vmul.f32 0.17677669, %v1122_v56  ;;  %v1121_v0 = vmul.f32 %v1119_v60, %v4029_v37  ;;  %v1354_v5 = vpop.permute.xlu0 %1353 }
 0x313   : > { %3164 = vmatpush3.xpose.msk.msra.mxu1 %vm1152_vm1, %v1150_v52 }
 0x314   : > { %v1123_v1 = vadd.f32 %v1121_v0, %v1098_v63  ;;  %3165 = vmatprep.mubr.msk.f32.mxu1 %vm1152_vm1, %v1124_v62  ;;  %3168 = vmatprep.subr.mxu1 %v4058_v61  ;;  %v1392_v13 = vpop.permute.xlu1 %1391 }
 0x316   : > { %v1125_v3 = vmul.f32 0.17677669, %v1123_v1  ;;  %v1356_v6 = vpop.permute.xlu0 %1355 }
 0x318   : > { %3166 = vmatmul.mubr.msk.f32.vlgmr.msra.gmra.mxu1 %vm1152_vm1, %v1125_v3  ;;  %v1384_v22 = vpop.permute.xlu1 %1383 }
 0x319   : > { %3169 = vmatpush3.msra.mxu1 %v4058_v61 }
 0x31a   : > { %3170 = vmatprep.subr.mxu1 %v4066_v4  ;;  %v1362_v8 = vpop.permute.xlu0 %1361 }
 0x31b   : > { %3171 = vmatpush3.msra.mxu1 %v4066_v4  ;;  %v1366_v50 = vsel %vm1117_vm0, %v1356_v6, %v1362_v8 }
 0x31c   : > { %v1390_v24 = vpop.permute.xlu1 %1389  ;;  %v1368_v52 = vmul.f32 %v1366_v50, %v4029_v37 }
 0x31d   : > { %v1395_v38 = vsel %vm1117_vm0, %v1384_v22, %v1390_v24 }
 0x31e   : > { %v1654_v18 = vpop.permute.xlu0 %1653  ;;  %v1397_v40 = vmul.f32 %v1395_v38, %v4023_v35 }
 0x320   : > { %v1360_v34 = vpop.permute.xlu1 %1359 }
 0x321   : > { %v1365_v45 = vsel %vm1117_vm0, %v1354_v5, %v1360_v34 }
 0x322   : > { %v1624_v23 = vpop.permute.xlu0 %1623  ;;  %v1367_v49 = vmul.f32 %v1365_v45, %v4023_v35 }
 0x324   : > { %v1662_v41 = vpop.permute.xlu1 %1661 }
 0x326   : > { %v1386_v32 = vpop.permute.xlu0 %1385 }
 0x327   : > { %v1396_v33 = vsel %vm1117_vm0, %v1386_v32, %v1392_v13 }
 0x328   : > { %v1398_v36 = vmul.f32 %v1396_v33, %v4029_v37  ;;  %v1660_v44 = vpop.permute.xlu1 %1659 }
 0x329   : > { %v1665_v48 = vsel %vm1117_vm0, %v1654_v18, %v1660_v44 }
 0x32a   : > { %v1656_v42 = vpop.permute.xlu0 %1655  ;;  %v1667_v51 = vmul.f32 %v1665_v48, %v4023_v35 }
 0x32b   : > { %v1666_v43 = vsel %vm1117_vm0, %v1656_v42, %v1662_v41 }
 0x32c   : > { %v1668_v47 = vmul.f32 %v1666_v43, %v4029_v37  ;;  %v1630_v53 = vpop.permute.xlu1 %1629 }
 0x32d   : > { %v1635_v54 = vsel %vm1117_vm0, %v1624_v23, %v1630_v53 }
 0x32e   : > { %v1637_v55 = vmul.f32 %v1635_v54, %v4023_v35 }
 0x3d8   : > { %v3167_v9 = vpop.f32.mrf.mxu1 }
 0x3d9   : > { %v4083_v11 = vadd.f32 %v3167_v9, %v4075_v7 }
 0x3da   : > { %v1231_v12 = vpop.f32.mrf.mxu1 }
 0x3db   : > { %v1232_v16 = vadd.f32 %v1231_v12, %v4080_v10  ;;  %v1243_v17 = vsel %vm1117_vm0, %v4083_v11, -inf }
 0x3dc   : > { %1244 = vmax.xlane.f32.xlu1 %v1243_v17 }
 0x3dd   : > { %v1240_v20 = vsel %vm1117_vm0, %v1232_v16, -inf }
 0x3de   : > { %1241 = vmax.xlane.f32.xlu0 %v1240_v20 }
 0x3ed   : > { %1631 = vrot.lane.b32.xlu1 %v3980_v29, %s3542_s4  ;;  %s3545_s4 = smov 64  }
 0x3f1   : > { %1403 = vrot.lane.b32.xlu1 %v1398_v36, %s3544_s26 }
 0x3f4   : > { %1625 = vrot.lane.b32.xlu0 %v3991_v31, %s3543_s24 }
 0x3f5   : > { %1401 = vrot.lane.b32.xlu1 %v1397_v40, %s3544_s26 }
 0x3f8   : > { %1347 = vrot.lane.b32.xlu0 %v4034_v39, %s3544_s26 }
 0x3f9   : > { %1617 = vrot.lane.b32.xlu1 %v4034_v39, %s3545_s4 }
 0x3fc   : > { %1345 = vrot.lane.b32.xlu0 %v4045_v46, %s3544_s26 }
 0x3fd   : > { %1673 = vrot.lane.b32.xlu1 %v1668_v47, %s3545_s4 }
 0x400   : > { %1371 = vrot.lane.b32.xlu0 %v1367_v49, %s3544_s26 }
 0x401   : > { %1671 = vrot.lane.b32.xlu1 %v1667_v51, %s3545_s4 }
 0x404   : > { %1373 = vrot.lane.b32.xlu0 %v1368_v52, %s3544_s26 }
 0x408   : > { %1615 = vrot.lane.b32.xlu0 %v4045_v46, %s3545_s4 }
 0x40c   : > { %1641 = vrot.lane.b32.xlu0 %v1637_v55, %s3545_s4 }
 0x465   : > { %v1245_v56 = vpop.xlane.xlu1 %1244 }
 0x466   : > { %v1247_v5 = vsub.f32 %v4083_v11, %v1245_v56 }
 0x467   : > { %v1242_v57 = vpop.xlane.xlu0 %1241 }
 0x468   : > { %v1246_v59 = vsub.f32 %v1232_v16, %v1242_v57  ;;  %v1250_v9 = vmul.f32 1.442695, %v1247_v5 }
 0x469   : > { %v1632_v62 = vpop.permute.xlu1 %1631 }
 0x46a   : > { %v1248_v60 = vmul.f32 1.442695, %v1246_v59 }
 0x46b   : > { %v1626_v63 = vpop.permute.xlu0 %1625 }
 0x46c   : > { %3348 = vpow2.f32 %v1248_v60  ;;  %v1636_v0 = vsel %vm1117_vm0, %v1626_v63, %v1632_v62 }
 0x46d   : > { %v1638_v1 = vmul.f32 %v1636_v0, %v4029_v37  ;;  %3350 = vpow2.f32 %v1250_v9  ;;  %v1404_v18 = vpop.permute.xlu1 %1403 }
 0x46f   : > { %1643 = vrot.lane.b32.xlu1 %v1638_v1, %s3545_s4  ;;  %v1348_v2 = vpop.permute.xlu0 %1347 }
 0x470   : > { %v1382_v16 = vmul.f32 %v1348_v2, %v3968_v25  ;;  %v1352_v32 = vmul.f32 %v1348_v2, %v3980_v29 }
 0x471   : > { %v1402_v40 = vpop.permute.xlu1 %1401 }
 0x472   : > { %v1408_v23 = vadd.f32 %v1404_v18, %v1382_v16 }
 0x473   : > { %v1346_v8 = vpop.permute.xlu0 %1345 }
 0x474   : > { %v1351_v17 = vmul.f32 %v1346_v8, %v3973_v27  ;;  %v1381_v45 = vmul.f32 %v1346_v8, %v3961_v21 }
 0x475   : > { %v1618_v44 = vpop.permute.xlu1 %1617 }
 0x476   : > { %v1407_v47 = vadd.f32 %v1402_v40, %v1381_v45  ;;  %v1652_v49 = vmul.f32 %v1618_v44, %v3968_v25 }
 0x477   : > { %v1372_v12 = vpop.permute.xlu0 %1371 }
 0x478   : > { %v1377_v24 = vadd.f32 %v1372_v12, %v1351_v17 }
 0x479   : > { %v3349_v3 = vpop.eup %3348  ;;  %v1674_v48 = vpop.permute.xlu1 %1673 }
 0x47a   : > { %v1252_v6 = vsel %vm1117_vm0, %v3349_v3, 0.0  ;;  %v3351_v22 = vpop.eup %3350  ;;  %v1379_v33 = vmul.f32 0.17677669, %v1377_v24  ;;  %v1678_v50 = vadd.f32 %v1674_v48, %v1652_v49 }
 0x47b   : > { %1253 = vadd.xlane.f32.xlu0 %v1252_v6  ;;  %v1374_v13 = vpop.permute.xlu0 %1373  ;;  %v1255_v11 = vsel %vm1117_vm0, %v3351_v22, 0.0 }
 0x47c   : > { %v1378_v34 = vadd.f32 %v1374_v13, %v1352_v32 }
 0x47d   : > { %v1672_v52 = vpop.permute.xlu1 %1671 }
 0x47e   : > { %v1380_v41 = vmul.f32 0.17677669, %v1378_v34 }
 0x47f   : > { %v1616_v20 = vpop.permute.xlu0 %1615 }
 0x480   : > { %v1621_v38 = vmul.f32 %v1616_v20, %v3973_v27  ;;  %v1651_v51 = vmul.f32 %v1616_v20, %v3961_v21 }
 0x482   : > { %v1677_v53 = vadd.f32 %v1672_v52, %v1651_v51 }
 0x483   : > { %v1642_v36 = vpop.permute.xlu0 %1641 }
 0x484   : > { %v1647_v42 = vadd.f32 %v1642_v36, %v1621_v38 }
 0x486   : > { %v1649_v43 = vmul.f32 0.17677669, %v1647_v42 }
 0x491   : > { %1419 = vrot.lane.b32.xlu0 %v1408_v23, %s3546_s21 }
 0x493   : > { %1256 = vadd.xlane.f32.xlu1 %v1255_v11 }
 0x495   : > { %1411 = vrot.lane.b32.xlu0 %v1379_v33, %s3546_s21 }
 0x499   : > { %1413 = vrot.lane.b32.xlu0 %v1380_v41, %s3546_s21 }
 0x49d   : > { %1681 = vrot.lane.b32.xlu0 %v1649_v43, %s3545_s4 }
 0x4a1   : > { %1923 = vrot.lane.b32.xlu0 %v3977_v28, %s3540_s0  ;;  %v1622_v28 = vmul.f32 %v1618_v44, %v3980_v29 }
 0x4a4   : > { %1417 = vrot.lane.b32.xlu1 %v1407_v47, %s3546_s21 }
 0x4a5   : > { %1891 = vrot.lane.b32.xlu0 %v3985_v30, %s3540_s0 }
 0x4a8   : > { %1689 = vrot.lane.b32.xlu1 %v1678_v50, %s3545_s4 }
 0x4a9   : > { %1893 = vrot.lane.b32.xlu0 %v3991_v31, %s3540_s0 }
 0x4ac   : > { %1687 = vrot.lane.b32.xlu1 %v1677_v53, %s3545_s4 }
 0x4e1   : > { %v1644_v54 = vpop.permute.xlu1 %1643 }
 0x4e2   : > { %v1648_v55 = vadd.f32 %v1644_v54, %v1622_v28 }
 0x4e4   : > { %v1650_v56 = vmul.f32 0.17677669, %v1648_v55 }
 0x4e6   : > { %1683 = vrot.lane.b32.xlu1 %v1650_v56, %s3545_s4 }
 0x4ea   : > { %1929 = vrot.lane.b32.xlu1 %v3968_v25, %s3543_s24 }
 0x4ee   : > { %1921 = vrot.lane.b32.xlu1 %v3971_v26, %s3540_s0  ;;  %s4515_s0 = sld [smem:[#allocation26_spill]] (!%p3008_p5) }
 0x4f2   : > { %1927 = vrot.lane.b32.xlu1 %v3961_v21, %s3543_s24 }
 0x504   : > { %v1254_v30 = vpop.xlane.xlu0 %1253 }
 0x505   : > { %3352 = vrcp.f32 %v1254_v30 }
 0x508   : > { %v1420_v31 = vpop.permute.xlu0 %1419 }
 0x509   : > { %3175 = vmatprep.subr.msk.mxu1 %vm1152_vm1, %v1420_v31 }
 0x50c   : > { %v1412_v62 = vpop.permute.xlu0 %1411 }
 0x510   : > { %v1414_v26 = vpop.permute.xlu0 %1413 }
 0x512   : > { %v3353_v57 = vpop.eup %3352 }
 0x513   : > { %v1260_v59 = vmul.f32 %v3353_v57, %v3349_v3 }
 0x514   : > { %v1682_v3 = vpop.permute.xlu0 %1681 }
 0x515   : > { %3172 = vmatprep.mubr.msk.f32.mxu1 %vm1117_vm0, %v1260_v59 }
 0x518   : > { %v1924_v11 = vpop.permute.xlu0 %1923 }
 0x51c   : > { %v1257_v60 = vpop.xlane.xlu1 %1256  ;;  %v1892_v41 = vpop.permute.xlu0 %1891 }
 0x51d   : > { %3354 = vrcp.f32 %v1257_v60 }
 0x520   : > { %v1418_v0 = vpop.permute.xlu1 %1417  ;;  %v1894_v42 = vpop.permute.xlu0 %1893 }
 0x524   : > { %v1690_v2 = vpop.permute.xlu1 %1689 }
 0x528   : > { %v1688_v5 = vpop.permute.xlu1 %1687 }
 0x52a   : > { %v3355_v63 = vpop.eup %3354 }
 0x52b   : > { %v1261_v1 = vmul.f32 %v3355_v63, %v3351_v22 }
 0x52d   : > { %3173 = vmatmul.mubr.msk.f32.vlgmr.msra.gmra.mxu1 %vm1117_vm0, %v1261_v1 }
 0x52e   : > { %3176 = vmatpush3.xpose.msk.msra.mxu1 %vm1152_vm1, %v1420_v31  ;;  %3179 = vmatprep.mubr.msk.f32.mxu1 %vm1152_vm1, %v1412_v62 }
 0x52f   : > { %3177 = vmatprep.subr.msk.mxu1 %vm1152_vm1, %v1418_v0 }
 0x532   : > { %3178 = vmatpush3.xpose.msk.msra.mxu1 %vm1152_vm1, %v1418_v0 }
 0x533   : > { %3189 = vmatprep.subr.msk.mxu1 %vm1152_vm1, %v1690_v2 }
 0x535   : > { %3180 = vmatmul.mubr.msk.f32.vlgmr.msra.gmra.mxu1 %vm1152_vm1, %v1414_v26 }
 0x536   : > { %3190 = vmatpush3.xpose.msk.msra.mxu1 %vm1152_vm1, %v1690_v2  ;;  %3193 = vmatprep.mubr.msk.f32.mxu1 %vm1152_vm1, %v1682_v3 }
 0x537   : > { %3191 = vmatprep.subr.msk.mxu1 %vm1152_vm1, %v1688_v5 }
 0x53a   : > { %3192 = vmatpush3.xpose.msk.msra.mxu1 %vm1152_vm1, %v1688_v5 }
 0x558   : > { %v1684_v6 = vpop.permute.xlu1 %1683 }
 0x559   : > { %3194 = vmatmul.mubr.msk.f32.vlgmr.msra.gmra.mxu1 %vm1152_vm1, %v1684_v6 }
 0x55c   : > { %v1930_v24 = vpop.permute.xlu1 %1929 }
 0x55d   : > { %v1934_v33 = vsel %vm1117_vm0, %v1924_v11, %v1930_v24 }
 0x55e   : > { %v1936_v36 = vmul.f32 %v1934_v33, %v4029_v37 }
 0x560   : > { %v1922_v32 = vpop.permute.xlu1 %1921 }
 0x564   : > { %v1928_v34 = vpop.permute.xlu1 %1927 }
 0x565   : > { %v1933_v38 = vsel %vm1117_vm0, %v1922_v32, %v1928_v34 }
 0x566   : > { %v1935_v40 = vmul.f32 %v1933_v38, %v4023_v35 }
 0x5ed   : > { %v4170_v8 = vpop.f32.mrf.mxu1 }
 0x5ef   : > { %v4172_v9 = vpop.f32.mrf.mxu1 }
 0x5f5   : > { %v4174_v12 = vpop.f32.mrf.mxu1 }
 0x5f7   : > { %v4176_v13 = vpop.f32.mrf.mxu1 }
 0x619   : > { %v3195_v16 = vpop.f32.mrf.mxu1 }
 0x61a   : > { %v1771_v17 = vadd.f32 %v3195_v16, %v4075_v7  ;;  %v1501_v16 = vadd.f32 %v4174_v12, %v4075_v7 }
 0x61b   : > { %v1765_v18 = vpop.f32.mrf.mxu1 }
 0x61c   : > { %v1766_v20 = vadd.f32 %v1765_v18, %v4080_v10  ;;  %v1777_v22 = vsel %vm1117_vm0, %v1771_v17, -inf }
 0x61d   : > { %1778 = vmax.xlane.f32.xlu1 %v1777_v22 }
 0x61e   : > { %v1774_v23 = vsel %vm1117_vm0, %v1766_v20, -inf }
 0x61f   : > { %1775 = vmax.xlane.f32.xlu0 %v1774_v23 }
 0x62e   : > { %1897 = vrot.lane.b32.xlu1 %v3973_v27, %s3543_s24 }
 0x632   : > { %1941 = vrot.lane.b32.xlu1 %v1936_v36, %s3546_s21 }
 0x635   : > { %1899 = vrot.lane.b32.xlu0 %v3980_v29, %s3543_s24  ;;  %s4510_s24 = scalar_lea.vmem %s4453_s10, %s3828_s16 }
 0x636   : > { %1939 = vrot.lane.b32.xlu1 %v1935_v40, %s3546_s21 }
 0x639   : > { %1885 = vrot.lane.b32.xlu0 %v4034_v39, %s3546_s21 }
 0x63d   : > { %1883 = vrot.lane.b32.xlu0 %v4045_v46, %s3546_s21 }
 0x6a6   : > { %v1779_v43 = vpop.xlane.xlu1 %1778 }
 0x6a7   : > { %v1781_v52 = vsub.f32 %v1771_v17, %v1779_v43  ;;  %v1507_v17 = vsel %vm1117_vm0, %v1501_v16, -inf }
 0x6a8   : > { %v1776_v44 = vpop.xlane.xlu0 %1775 }
 0x6a9   : > { %v1780_v39 = vsub.f32 %v1766_v20, %v1776_v44 }
 0x6aa   : > { %v1898_v45 = vpop.permute.xlu1 %1897 }
 0x6ab   : > { %v1903_v47 = vsel %vm1117_vm0, %v1892_v41, %v1898_v45  ;;  %v1782_v46 = vmul.f32 1.442695, %v1780_v39 }
 0x6ac   : > { %v1905_v48 = vmul.f32 %v1903_v47, %v4023_v35  ;;  %v1900_v49 = vpop.permute.xlu0 %1899  ;;  %v1784_v35 = vmul.f32 1.442695, %v1781_v52 }
 0x6ad   : > { %v1904_v50 = vsel %vm1117_vm0, %v1894_v42, %v1900_v49  ;;  %3356 = vpow2.f32 %v1782_v46 }
 0x6ae   : > { %v1906_v51 = vmul.f32 %v1904_v50, %v4029_v37  ;;  %1909 = vrot.lane.b32.xlu0 %v1905_v48, %s3546_s21  ;;  %3358 = vpow2.f32 %v1784_v35  ;;  %v1942_v56 = vpop.permute.xlu1 %1941 }
 0x6b0   : > { %1911 = vrot.lane.b32.xlu1 %v1906_v51, %s3546_s21  ;;  %v1886_v55 = vpop.permute.xlu0 %1885 }
 0x6b1   : > { %v1920_v31 = vmul.f32 %v1886_v55, %v3968_v25  ;;  %v1890_v1 = vmul.f32 %v1886_v55, %v3980_v29 }
 0x6b2   : > { %1798 = vrot.lane.b32.xlu0 %v4058_v61, %s3545_s4  ;;  %v1940_v60 = vpop.permute.xlu1 %1939 }
 0x6b3   : > { %v1946_v59 = vadd.f32 %v1942_v56, %v1920_v31 }
 0x6b4   : > { %1796 = vrot.lane.b32.xlu1 %v4066_v4, %s3545_s4  ;;  %v1884_v30 = vpop.permute.xlu0 %1883 }
 0x6b5   : > { %v1919_v57 = vmul.f32 %v1884_v30, %v3961_v21  ;;  %v1889_v63 = vmul.f32 %v1884_v30, %v3973_v27  ;;  %v1496_v27 = vadd.f32 %v4176_v13, %v4080_v10 }
 0x6b7   : > { %v1945_v62 = vadd.f32 %v1940_v60, %v1919_v57  ;;  %v1504_v29 = vsel %vm1117_vm0, %v1496_v27, -inf }
 0x6ba   : > { %v3357_v53 = vpop.eup %3356 }
 0x6bb   : > { %v1786_v28 = vsel %vm1117_vm0, %v3357_v53, 0.0  ;;  %v3359_v37 = vpop.eup %3358 }
 0x6bc   : > { %v1789_v54 = vsel %vm1117_vm0, %v3359_v37, 0.0 }
 0x6d1   : > { %1787 = vadd.xlane.f32.xlu0 %v1786_v28 }
 0x6d8   : > { %1790 = vadd.xlane.f32.xlu1 %v1789_v54 }
 0x6e7   : > { %1957 = vrot.lane.b32.xlu0 %v1946_v59, %s3544_s26 }
 0x6e9   : > { %1955 = vrot.lane.b32.xlu1 %v1945_v62, %s3544_s26 }
 0x720   : > { %v1910_v0 = vpop.permute.xlu0 %1909 }
 0x721   : > { %v1915_v26 = vadd.f32 %v1910_v0, %v1889_v63 }
 0x722   : > { %v1912_v2 = vpop.permute.xlu1 %1911 }
 0x723   : > { %v1917_v3 = vmul.f32 0.17677669, %v1915_v26  ;;  %v1916_v5 = vadd.f32 %v1912_v2, %v1890_v1 }
 0x724   : > { %v1799_v6 = vpop.permute.xlu0 %1798 }
 0x725   : > { %v1918_v25 = vmul.f32 0.17677669, %v1916_v5  ;;  %3196 = vmatprep.subr.mxu1 %v1799_v6  ;;  %1949 = vrot.lane.b32.xlu0 %v1917_v3, %s3544_s26 }
 0x726   : > { %3197 = vmatpush3.msra.mxu1 %v1799_v6  ;;  %v1797_v21 = vpop.permute.xlu1 %1796 }
 0x727   : > { %1951 = vrot.lane.b32.xlu1 %v1918_v25, %s3544_s26  ;;  %3198 = vmatprep.subr.mxu1 %v1797_v21 }
 0x728   : > { %3199 = vmatpush3.msra.mxu1 %v1797_v21 }
 0x744   : > { %1505 = vmax.xlane.f32.xlu0 %v1504_v29  ;;  %v2198_v29 = vld [vmem:[%s3843_s14 + $0x78] sm:$0xff] }
 0x74b   : > { %1508 = vmax.xlane.f32.xlu1 %v1507_v17  ;;  %v2196_v17 = vld [vmem:[%s3843_s14 + $0x68] sm:$0xff] }
 0x75a   : > { %v1788_v18 = vpop.xlane.xlu0 %1787 }
 0x75b   : > { %3360 = vrcp.f32 %v1788_v18  ;;  %v2195_v18 = vld [vmem:[%s3843_s14 + $0x60] sm:$0xff] }
 0x75e   : > { %v1958_v20 = vpop.permute.xlu0 %1957 }
 0x75f   : > { %3203 = vmatprep.subr.msk.mxu1 %vm1152_vm1, %v1958_v20 }
 0x761   : > { %v1791_v22 = vpop.xlane.xlu1 %1790 }
 0x762   : > { %3362 = vrcp.f32 %v1791_v22  ;;  %v2193_v22 = vld [vmem:[%s3843_s14 + $0x50] sm:$0xff] }
 0x765   : > { %v1956_v11 = vpop.permute.xlu1 %1955 }
 0x768   : > { %v3361_v23 = vpop.eup %3360 }
 0x769   : > { %v1794_v24 = vmul.f32 %v3361_v23, %v3357_v53  ;;  %v2192_v23 = vld [vmem:[%s3843_s14 + $0x48] sm:$0xff] }
 0x76b   : > { %3200 = vmatprep.mubr.msk.f32.mxu1 %vm1117_vm0, %v1794_v24  ;;  %v2191_v24 = vld [vmem:[%s3843_s14 + $0x40] sm:$0xff] }
 0x76f   : > { %v3363_v13 = vpop.eup %3362 }
 0x770   : > { %v1795_v32 = vmul.f32 %v3363_v13, %v3359_v37  ;;  %v2190_v13 = vld [vmem:[%s3843_s14 + $0x38] sm:$0xff] }
 0x772   : > { %3201 = vmatmul.mubr.msk.f32.vlgmr.msra.gmra.mxu1 %vm1117_vm0, %v1795_v32  ;;  %v2189_v32 = vld [vmem:[%s3843_s14 + $0x30] sm:$0xff] }
 0x773   : > { %3204 = vmatpush3.xpose.msk.msra.mxu1 %vm1152_vm1, %v1958_v20  ;;  %v2194_v20 = vld [vmem:[%s3843_s14 + $0x58] sm:$0xff] }
 0x774   : > { %3205 = vmatprep.subr.msk.mxu1 %vm1152_vm1, %v1956_v11 }
 0x777   : > { %3206 = vmatpush3.xpose.msk.msra.mxu1 %vm1152_vm1, %v1956_v11  ;;  %v2188_v11 = vld [vmem:[%s3843_s14 + $0x28] sm:$0xff] }
 0x797   : > { %v1950_v12 = vpop.permute.xlu0 %1949 }
 0x798   : > { %3207 = vmatprep.mubr.msk.f32.mxu1 %vm1152_vm1, %v1950_v12  ;;  %v2187_v12 = vld [vmem:[%s3843_s14 + $0x20] sm:$0xff] }
 0x799   : > { %v1952_v33 = vpop.permute.xlu1 %1951 }
 0x79a   : > { %3208 = vmatmul.mubr.msk.f32.vlgmr.msra.gmra.mxu1 %vm1152_vm1, %v1952_v33  ;;  %v2186_v33 = vld [vmem:[%s3843_s14 + $0x18] sm:$0xff] }
 0x79b   : > { %2431 = vmatprep.mubr.f32.mxu1 %v3539_v58 }
 0x7cd   : > { %v1506_v45 = vpop.xlane.xlu0 %1505 }
 0x7ce   : > { %v1510_v47 = vsub.f32 %v1496_v27, %v1506_v45 }
 0x7d0   : > { %v1512_v48 = vmul.f32 1.442695, %v1510_v47 }
 0x7d4   : > { %v1509_v34 = vpop.xlane.xlu1 %1508 }
 0x7d5   : > { %v1511_v36 = vsub.f32 %v1501_v16, %v1509_v34  ;;  %v2197_v16 = vld [vmem:[%s3843_s14 + $0x70] sm:$0xff] }
 0x7d6   : > { %v2185_v34 = vld [vmem:[%s3843_s14 + $0x10] sm:$0xff] }
 0x7d7   : > { %v1514_v38 = vmul.f32 1.442695, %v1511_v36 }
 0x7d9   : > { %3364 = vpow2.f32 %v1514_v38 }
 0x7da   : > { %3366 = vpow2.f32 %v1512_v48 }
 0x7e6   : > { %v3365_v40 = vpop.eup %3364 }
 0x7e7   : > { %v1519_v41 = vsel %vm1117_vm0, %v3365_v40, 0.0  ;;  %v3367_v35 = vpop.eup %3366 }
 0x7e8   : > { %1520 = vadd.xlane.f32.xlu1 %v1519_v41  ;;  %v1516_v53 = vsel %vm1117_vm0, %v3367_v35, 0.0  ;;  %v2183_v41 = vld [vmem:[%s3843_s14] sm:$0xff] }
 0x832   : > { %v3202_v42 = vpop.f32.mrf.mxu1 }
 0x834   : > { %v1874_v43 = vpop.f32.mrf.mxu1 }
 0x835   : > { %v3334_v44 = vpack.i.bf16 %v3202_v42, %v1874_v43 }
 0x85a   : > { %v3209_v49 = vpop.f32.mrf.mxu1 }
 0x85b   : > { %v2039_v39 = vadd.f32 %v3209_v49, %v4075_v7 }
 0x85c   : > { %v2033_v50 = vpop.f32.mrf.mxu1 }
 0x85d   : > { %v2034_v51 = vadd.f32 %v2033_v50, %v4080_v10  ;;  %v2045_v52 = vsel %vm1117_vm0, %v2039_v39, -inf }
 0x85f   : > { %v2042_v46 = vsel %vm1117_vm0, %v2034_v51, -inf }
 0x860   : > { %2043 = vmax.xlane.f32.xlu0 %v2042_v46 }
 0x864   : > { %2046 = vmax.xlane.f32.xlu0 %v2045_v52 }
 0x868   : > { %1517 = vadd.xlane.f32.xlu0 %v1516_v53 }
 0x871   : > { %v1521_v63 = vpop.xlane.xlu1 %1520 }
 0x8e9   : > { %v2044_v28 = vpop.xlane.xlu0 %2043 }
 0x8ea   : > { %v2048_v37 = vsub.f32 %v2034_v51, %v2044_v28 }
 0x8ec   : > { %v2050_v54 = vmul.f32 1.442695, %v2048_v37 }
 0x8ed   : > { %v2047_v55 = vpop.xlane.xlu0 %2046 }
 0x8ee   : > { %3368 = vpow2.f32 %v2050_v54  ;;  %v2049_v56 = vsub.f32 %v2039_v39, %v2047_v55 }
 0x8f0   : > { %v2052_v30 = vmul.f32 1.442695, %v2049_v56 }
 0x8f1   : > { %v1518_v10 = vpop.xlane.xlu0 %1517 }
 0x8f2   : > { %3370 = vpow2.f32 %v2052_v30 }
 0x8f3   : > { %3372 = vrcp.f32 %v1518_v10 }
 0x8f4   : > { %3374 = vrcp.f32 %v1521_v63  ;;  %v2353_v63 = vld [vmem:[%s3820_s20 + $0xf0] sm:$0xff] }
 0x8fb   : > { %v3369_v7 = vpop.eup %3368 }
 0x8fc   : > { %v2054_v31 = vsel %vm1117_vm0, %v3369_v7, 0.0 }
 0x8fd   : > { %2055 = vadd.xlane.f32.xlu0 %v2054_v31 }
 0x8ff   : > { %v3371_v57 = vpop.eup %3370 }
 0x900   : > { %v3373_v59 = vpop.eup %3372  ;;  %v2057_v60 = vsel %vm1117_vm0, %v3371_v57, 0.0 }
 0x901   : > { %2058 = vadd.xlane.f32.xlu1 %v2057_v60  ;;  %v1524_v62 = vmul.f32 %v3373_v59, %v3367_v35  ;;  %v3375_v2 = vpop.eup %3374  ;;  %v3401_v59 = vld [vmem:[#allocation2] sm:$0xff] }
 0x902   : > { %v1525_v5 = vmul.f32 %v3375_v2, %v3365_v40  ;;  %v2184_v40 = vld [vmem:[%s3843_s14 + $0x8] sm:$0xff]  ;;  %v2349_v2 = vld [vmem:[%s3820_s20 + $0xd0] sm:$0xff] }
 0x903   : > { %3186 = vmatprep.mubr.msk.f32.mxu0 %vm1117_vm0, %v1524_v62  ;;  %v2354_v62 = vld [vmem:[%s3820_s20 + $0xf8] sm:$0xff] }
 0x904   : > { %2367 = vmatprep.subr.mxu1 %v2354_v62  ;;  %v2582_v62 = vld [vmem:[%s3872_s18 + $0xf0] sm:$0xff] }
 0x905   : > { %2368 = vmatpush1.msra.mxu1 %v2353_v63  ;;  %v2566_v63 = vld [vmem:[%s3872_s18 + $0x70] sm:$0xff] }
 0x912   : > { %1528 = vrot.lane.b32.xlu1 %v4066_v4, %s3546_s21 }
 0x913   : > { %1530 = vrot.lane.b32.xlu0 %v4058_v61, %s3546_s21 }
 0x916   : > { %2066 = vrot.lane.b32.xlu1 %v4058_v61, %s3544_s26 }
 0x91a   : > { %2064 = vrot.lane.b32.xlu1 %v4066_v4, %s3544_s26 }
 0x91e   : > { %3335 = vrot.lane.b32.xlu1 %v3334_v44, %s3545_s4  ;;  %s4514_s4 = sld [smem:[#allocation17_spill]] (!%p3008_p5) }
 0x986   : > { %v2056_v0 = vpop.xlane.xlu0 %2055 }
 0x987   : > { %3376 = vrcp.f32 %v2056_v0  ;;  %v2352_v0 = vld [vmem:[%s3820_s20 + $0xe8] sm:$0xff] }
 0x988   : > { %2369 = vmatprep.subr.mxu1 %v2352_v0  ;;  %v2581_v0 = vld [vmem:[%s3872_s18 + $0xe8] sm:$0xff] }
 0x98a   : > { %v1531_v1 = vpop.permute.xlu0 %1530  ;;  %v2059_v26 = vpop.xlane.xlu1 %2058 }
 0x98b   : > { %3378 = vrcp.f32 %v2059_v26  ;;  %3182 = vmatprep.subr.mxu0 %v1531_v1  ;;  %v2350_v26 = vld [vmem:[%s3820_s20 + $0xd8] sm:$0xff] }
 0x98c   : > { %3183 = vmatpush3.msra.mxu0 %v1531_v1  ;;  %v2351_v1 = vld [vmem:[%s3820_s20 + $0xe0] sm:$0xff] }
 0x98d   : > { %2370 = vmatpush1.msra.mxu1 %v2351_v1  ;;  %v2565_v1 = vld [vmem:[%s3872_s18 + $0x68] sm:$0xff] }
 0x98e   : > { %v1529_v3 = vpop.permute.xlu1 %1528  ;;  %2371 = vmatprep.subr.mxu1 %v2350_v26  ;;  %v2564_v26 = vld [vmem:[%s3872_s18 + $0x60] sm:$0xff] }
 0x98f   : > { %3184 = vmatprep.subr.mxu0 %v1529_v3  ;;  %2372 = vmatpush1.msra.mxu1 %v2349_v2  ;;  %v2579_v2 = vld [vmem:[%s3872_s18 + $0xd8] sm:$0xff] }
 0x990   : > { %3185 = vmatpush3.msra.mxu0 %v1529_v3  ;;  %v2348_v3 = vld [vmem:[%s3820_s20 + $0xc8] sm:$0xff] }
 0x991   : > { %3187 = vmatmul.mubr.msk.f32.vlgmr.msra.gmra.mxu0 %vm1117_vm0, %v1525_v5  ;;  %v2347_v5 = vld [vmem:[%s3820_s20 + $0xc0] sm:$0xff]  ;;  %2373 = vmatprep.subr.mxu1 %v2348_v3  ;;  %v2563_v3 = vld [vmem:[%s3872_s18 + $0x58] sm:$0xff] }
 0x992   : > { %v2067_v61 = vpop.permute.xlu1 %2066  ;;  %2374 = vmatpush1.msra.mxu1 %v2347_v5  ;;  %v2578_v5 = vld [vmem:[%s3872_s18 + $0xd0] sm:$0xff] }
 0x993   : > { %3210 = vmatprep.subr.mxu0 %v2067_v61 }
 0x994   : > { %v3377_v4 = vpop.eup %3376  ;;  %3211 = vmatpush3.msra.mxu0 %v2067_v61 }
 0x995   : > { %v2062_v6 = vmul.f32 %v3377_v4, %v3369_v7  ;;  %v3400_v7 = vld [vmem:[#allocation2 + $0x8] sm:$0xff] }
 0x996   : > { %v2065_v25 = vpop.permute.xlu1 %2064 }
 0x997   : > { %3212 = vmatprep.subr.mxu0 %v2065_v25  ;;  %3214 = vmatprep.mubr.msk.f32.mxu0 %vm1117_vm0, %v2062_v6 }
 0x998   : > { %v3379_v21 = vpop.eup %3378  ;;  %3213 = vmatpush3.msra.mxu0 %v2065_v25 }
 0x999   : > { %v2063_v27 = vmul.f32 %v3379_v21, %v3371_v57  ;;  %3217 = vmatprep.subr.mxu0 %v2198_v29 }
 0x99a   : > { %v3336_v50 = vpop.permute.xlu1 %3335 }
 0x99b   : > { %3215 = vmatmul.mubr.msk.f32.vlgmr.msra.gmra.mxu0 %vm1117_vm0, %v2063_v27  ;;  %v3338_v46 = vunpack.i.h.bf16 %v3336_v50  ;;  %v3337_v52 = vunpack.i.l.bf16 %v3336_v50  ;;  %v2323_v50 = vld [vmem:[%s3820_s20] sm:$0xff] }
 0x99c   : > { %3218 = vmatpush3.msra.mxu0 %v2198_v29 }
 0x99d   : > { %3219 = vmatprep.subr.mxu0 %v2197_v16 }
 0x99e   : > { %3220 = vmatpush3.msra.mxu0 %v2197_v16 }
 0x99f   : > { %3221 = vmatprep.subr.mxu0 %v2196_v17 }
 0x9a0   : > { %3222 = vmatpush3.msra.mxu0 %v2196_v17  ;;  %v2346_v17 = vld [vmem:[%s3820_s20 + $0xb8] sm:$0xff] }
 0x9a1   : > { %3223 = vmatprep.subr.mxu0 %v2195_v18  ;;  %2375 = vmatprep.subr.mxu1 %v2346_v17  ;;  %v2558_v17 = vld [vmem:[%s3872_s18 + $0x30] sm:$0xff] }
 0x9a2   : > { %3224 = vmatpush3.msra.mxu0 %v2195_v18  ;;  %v2345_v18 = vld [vmem:[%s3820_s20 + $0xb0] sm:$0xff] }
 0x9a3   : > { %3225 = vmatprep.subr.mxu0 %v2194_v20  ;;  %2376 = vmatpush1.msra.mxu1 %v2345_v18  ;;  %v2573_v18 = vld [vmem:[%s3872_s18 + $0xa8] sm:$0xff] }
 0x9a4   : > { %3226 = vmatpush3.msra.mxu0 %v2194_v20  ;;  %v2344_v20 = vld [vmem:[%s3820_s20 + $0xa8] sm:$0xff] }
 0x9a5   : > { %3227 = vmatprep.subr.mxu0 %v2193_v22  ;;  %2377 = vmatprep.subr.mxu1 %v2344_v20  ;;  %v2557_v20 = vld [vmem:[%s3872_s18 + $0x28] sm:$0xff] }
 0x9a6   : > { %3228 = vmatpush3.msra.mxu0 %v2193_v22  ;;  %v2343_v22 = vld [vmem:[%s3820_s20 + $0xa0] sm:$0xff] }
 0x9a7   : > { %3229 = vmatprep.subr.mxu0 %v2192_v23  ;;  %2378 = vmatpush1.msra.mxu1 %v2343_v22  ;;  %v2572_v22 = vld [vmem:[%s3872_s18 + $0xa0] sm:$0xff] }
 0x9a8   : > { %3230 = vmatpush3.msra.mxu0 %v2192_v23  ;;  %v2342_v23 = vld [vmem:[%s3820_s20 + $0x98] sm:$0xff] }
 0x9a9   : > { %3231 = vmatprep.subr.mxu0 %v2191_v24  ;;  %2379 = vmatprep.subr.mxu1 %v2342_v23  ;;  %v2556_v23 = vld [vmem:[%s3872_s18 + $0x20] sm:$0xff] }
 0x9aa   : > { %3232 = vmatpush3.msra.mxu0 %v2191_v24  ;;  %v2341_v24 = vld [vmem:[%s3820_s20 + $0x90] sm:$0xff] }
 0x9ab   : > { %3233 = vmatprep.subr.mxu0 %v2190_v13  ;;  %2380 = vmatpush1.msra.mxu1 %v2341_v24  ;;  %v2571_v24 = vld [vmem:[%s3872_s18 + $0x98] sm:$0xff] }
 0x9ac   : > { %3234 = vmatpush3.msra.mxu0 %v2190_v13  ;;  %v2340_v13 = vld [vmem:[%s3820_s20 + $0x88] sm:$0xff] }
 0x9ad   : > { %3235 = vmatprep.subr.mxu0 %v2189_v32  ;;  %2381 = vmatprep.subr.mxu1 %v2340_v13  ;;  %v2555_v13 = vld [vmem:[%s3872_s18 + $0x18] sm:$0xff] }
 0x9ae   : > { %3236 = vmatpush3.msra.mxu0 %v2189_v32  ;;  %v2339_v32 = vld [vmem:[%s3820_s20 + $0x80] sm:$0xff] }
 0x9af   : > { %3237 = vmatprep.subr.mxu0 %v2188_v11  ;;  %2382 = vmatpush1.msra.mxu1 %v2339_v32  ;;  %v2570_v32 = vld [vmem:[%s3872_s18 + $0x90] sm:$0xff] }
 0x9b0   : > { %3238 = vmatpush3.msra.mxu0 %v2188_v11  ;;  %v2338_v11 = vld [vmem:[%s3820_s20 + $0x78] sm:$0xff] }
 0x9b1   : > { %3239 = vmatprep.subr.mxu0 %v2187_v12  ;;  %2383 = vmatprep.subr.mxu1 %v2338_v11  ;;  %v2554_v11 = vld [vmem:[%s3872_s18 + $0x10] sm:$0xff] }
 0x9b2   : > { %3240 = vmatpush3.msra.mxu0 %v2187_v12  ;;  %v2337_v12 = vld [vmem:[%s3820_s20 + $0x70] sm:$0xff] }
 0x9b3   : > { %3241 = vmatprep.subr.mxu0 %v2186_v33  ;;  %2384 = vmatpush1.msra.mxu1 %v2337_v12  ;;  %v2569_v12 = vld [vmem:[%s3872_s18 + $0x88] sm:$0xff] }
 0x9b4   : > { %3242 = vmatpush3.msra.mxu0 %v2186_v33  ;;  %v2336_v33 = vld [vmem:[%s3820_s20 + $0x68] sm:$0xff] }
 0x9b5   : > { %3243 = vmatprep.subr.mxu0 %v2185_v34  ;;  %2385 = vmatprep.subr.mxu1 %v2336_v33  ;;  %v2553_v33 = vld [vmem:[%s3872_s18 + $0x8] sm:$0xff] }
 0x9b6   : > { %3244 = vmatpush3.msra.mxu0 %v2185_v34  ;;  %v2335_v34 = vld [vmem:[%s3820_s20 + $0x60] sm:$0xff] }
 0x9b7   : > { %3245 = vmatprep.subr.mxu0 %v2184_v40  ;;  %2386 = vmatpush1.msra.mxu1 %v2335_v34  ;;  %v2568_v34 = vld [vmem:[%s3872_s18 + $0x80] sm:$0xff] }
 0x9b8   : > { %3246 = vmatpush3.msra.mxu0 %v2184_v40  ;;  %v2332_v40 = vld [vmem:[%s3820_s20 + $0x48] sm:$0xff] }
 0x9b9   : > { %3247 = vmatprep.subr.mxu0 %v2183_v41 }
 0x9ba   : > { %3248 = vmatpush3.msra.mxu0 %v2183_v41  ;;  %v2331_v41 = vld [vmem:[%s3820_s20 + $0x40] sm:$0xff] }
 0xa51   : > { %v3188_v36 = vpop.f32.mrf.mxu0 }
 0xa53   : > { %v1606_v38 = vpop.f32.mrf.mxu0 }
 0xa54   : > { %v3329_v42 = vpack.i.bf16 %v3188_v36, %v1606_v38  ;;  %v2334_v36 = vld [vmem:[%s3820_s20 + $0x58] sm:$0xff]  ;;  %v2333_v38 = vld [vmem:[%s3820_s20 + $0x50] sm:$0xff] }
 0xa55   : > { %2387 = vmatprep.subr.mxu1 %v2334_v36  ;;  %v2552_v36 = vld [vmem:[%s3872_s18] sm:$0xff] }
 0xa56   : > { %3330 = vrot.lane.b32.xlu0 %v3329_v42, %s3544_s26  ;;  %2388 = vmatpush1.msra.mxu1 %v2333_v38  ;;  %v2330_v42 = vld [vmem:[%s3820_s20 + $0x38] sm:$0xff]  ;;  %v2355_v38 = vld [vmem:[%s3866_s15] sm:$0x3] }
 0xa57   : > { %2389 = vmatprep.subr.mxu1 %v2332_v40  ;;  %v2360_v40 = vrot.slane %v2355_v38, %v932_v19 }
 0xa58   : > { %2390 = vmatpush1.msra.mxu1 %v2331_v41  ;;  %v2364_v41 = vrot.slane %v2355_v38, %v936_v15 }
 0xa59   : > { %2391 = vmatprep.subr.mxu1 %v2330_v42 }
 0xa5b   : > { %v3216_v43 = vpop.f32.mrf.mxu0 }
 0xa5d   : > { %v2142_v44 = vpop.f32.mrf.mxu0 }
 0xa5e   : > { %v3339_v45 = vpack.i.bf16 %v3216_v43, %v2142_v44  ;;  %v2329_v43 = vld [vmem:[%s3820_s20 + $0x30] sm:$0xff]  ;;  %v2328_v44 = vld [vmem:[%s3820_s20 + $0x28] sm:$0xff] }
 0xa5f   : > { %2392 = vmatpush1.msra.mxu1 %v2329_v43 }
 0xa60   : > { %3340 = vrot.lane.b32.xlu0 %v3339_v45, %s3546_s21  ;;  %v2327_v45 = vld [vmem:[%s3820_s20 + $0x20] sm:$0xff]  ;;  %2393 = vmatprep.subr.mxu1 %v2328_v44 }
 0xa61   : > { %2394 = vmatpush1.msra.mxu1 %v2327_v45 }
 0xac8   : > { %v3331_v47 = vpop.permute.xlu0 %3330 }
 0xac9   : > { %v3333_v48 = vunpack.i.h.bf16 %v3331_v47  ;;  %v3332_v49 = vunpack.i.l.bf16 %v3331_v47  ;;  %v2326_v47 = vld [vmem:[%s3820_s20 + $0x18] sm:$0xff] }
 0xaca   : > { %2395 = vmatprep.subr.mxu1 %v2326_v47 }
 0xacb   : > { %v2176_v51 = vsel %vm1152_vm1, %v4170_v8, %v3333_v48  ;;  %v2175_v39 = vsel %vm1152_vm1, %v4172_v9, %v3332_v49  ;;  %v3004_v8 = vld [vmem:[%s4510_s24] ss:$0 sm:$0xff]  ;;  %v2324_v49 = vld [vmem:[%s3820_s20 + $0x8] sm:$0xff] }
 0xacc   : > { %v2178_v37 = vsel %vm2177_vm2, %v2175_v39, %v3337_v52  ;;  %v2179_v54 = vsel %vm2177_vm2, %v2176_v51, %v3338_v46  ;;  %v2325_v48 = vld [vmem:[%s3820_s20 + $0x10] sm:$0xff] }
 0xacd   : > { %2396 = vmatpush1.msra.mxu1 %v2325_v48 }
 0xace   : > { %2397 = vmatprep.subr.mxu1 %v2324_v49 }
 0xacf   : > { %2398 = vmatpush1.msra.mxu1 %v2323_v50 }
 0xad2   : > { %v3341_v35 = vpop.permute.xlu0 %3340 }
 0xad3   : > { %v3343_v53 = vunpack.i.h.bf16 %v3341_v35  ;;  %v3342_v28 = vunpack.i.l.bf16 %v3341_v35 }
 0xad5   : > { %v2181_v55 = vsel %vm2180_vm3, %v2178_v37, %v3342_v28  ;;  %v2182_v56 = vsel %vm2180_vm3, %v2179_v54, %v3343_v53  ;;  %v3005_v37 = vld [vmem:[%s812_s25] ss:$0 sm:$0xff] }
 0xad6   : > { %3249 = vmatprep.mubr.f32.mxu0 %v2181_v55  ;;  %v3006_v55 = vld [vmem:[%s815_s7] ss:$0 sm:$0xff] }
 0xad7   : > { %3250 = vmatmul.mubr.f32.vlgmr.msra.gmra.mxu0 %v2182_v56 }
 0xb97   : > { %v3251_v9 = vpop.f32.mrf.mxu0 }
 0xb98   : > { %v2278_v30 = vadd.f32 %v3251_v9, %v3004_v8 }
 0xb99   : > { %v2272_v10 = vpop.f32.mrf.mxu0 }
 0xb9a   : > { %v4279_v31 = vadd.f32 %v3400_v7, %v2278_v30  ;;  %v2273_v57 = vadd.f32 %v3004_v8, %v2272_v10 }
 0xb9c   : > { %v4281_v60 = vadd.f32 %v3401_v59, %v2273_v57  ;;  %2287 = vadd.xlane.f32.xlu0 %v4279_v31  ;;  %v2583_v57 = vld [vmem:[%s3872_s18 + $0xf8] sm:$0xff] }
 0xb9d   : > { %3085 = vmatprep.subr.mxu0 %v2583_v57  ;;  %v2567_v59 = vld [vmem:[%s3872_s18 + $0x78] sm:$0xff] }
 0xb9e   : > { %2285 = vadd.xlane.f32.xlu1 %v4281_v60  ;;  %3086 = vmatpush3.msra.mxu0 %v2567_v59 }
 0xb9f   : > { %3087 = vmatprep.subr.mxu0 %v2582_v62 }
 0xba0   : > { %3088 = vmatpush3.msra.mxu0 %v2566_v63 }
 0xba1   : > { %3089 = vmatprep.subr.mxu0 %v2581_v0 }
 0xba2   : > { %3090 = vmatpush3.msra.mxu0 %v2565_v1 }
 0xc25   : > { %v2288_v61 = vpop.xlane.xlu0 %2287 }
 0xc26   : > { %v2290_v6 = vmul.f32 0.0078125, %v2288_v61  ;;  %v2562_v61 = vld [vmem:[%s3872_s18 + $0x50] sm:$0xff] }
 0xc27   : > { %v2286_v4 = vpop.xlane.xlu1 %2285 }
 0xc28   : > { %v2289_v25 = vmul.f32 0.0078125, %v2286_v4  ;;  %v4297_v27 = vsub.f32 %v4279_v31, %v2290_v6  ;;  %v2577_v4 = vld [vmem:[%s3872_s18 + $0xc8] sm:$0xff] }
 0xc29   : > { %v2561_v6 = vld [vmem:[%s3872_s18 + $0x48] sm:$0xff] }
 0xc2a   : > { %v4294_v21 = vsub.f32 %v4281_v60, %v2289_v25  ;;  %v2294_v16 = vmul.f32 %v4297_v27, %v4297_v27  ;;  %v2576_v25 = vld [vmem:[%s3872_s18 + $0xc0] sm:$0xff] }
 0xc2c   : > { %v2293_v29 = vmul.f32 %v4294_v21, %v4294_v21 }
 0xc2e   : > { %2295 = vadd.xlane.f32.xlu0 %v2293_v29  ;;  %v2559_v29 = vld [vmem:[%s3872_s18 + $0x38] sm:$0xff] }
 0xc32   : > { %2297 = vadd.xlane.f32.xlu0 %v2294_v16  ;;  %v2574_v16 = vld [vmem:[%s3872_s18 + $0xb0] sm:$0xff] }
 0xcb7   : > { %v2296_v51 = vpop.xlane.xlu0 %2295 }
 0xcb8   : > { %v2299_v39 = vmul.f32 0.0078125, %v2296_v51 }
 0xcba   : > { %v2301_v46 = vadd.f32 1e-05, %v2299_v39 }
 0xcbb   : > { %v2298_v52 = vpop.xlane.xlu0 %2297 }
 0xcbc   : > { %3380 = vrsqrt.f32 %v2301_v46  ;;  %v2300_v35 = vmul.f32 0.0078125, %v2298_v52 }
 0xcbe   : > { %v2302_v53 = vadd.f32 1e-05, %v2300_v35 }
 0xcc0   : > { %3382 = vrsqrt.f32 %v2302_v53 }
 0xcc9   : > { %v3381_v28 = vpop.eup %3380 }
 0xcca   : > { %v2305_v54 = vmul.f32 %v3381_v28, %v4294_v21  ;;  %v2560_v21 = vld [vmem:[%s3872_s18 + $0x40] sm:$0xff] }
 0xccc   : > { %v2313_v56 = vmul.f32 %v3005_v37, %v2305_v54 }
 0xccd   : > { %v3383_v8 = vpop.eup %3382 }
 0xcce   : > { %v2321_v9 = vadd.f32 %v3006_v55, %v2313_v56  ;;  %v2306_v30 = vmul.f32 %v3383_v8, %v4297_v27  ;;  %v2575_v27 = vld [vmem:[%s3872_s18 + $0xb8] sm:$0xff] }
 0xcd0   : > { %2432 = vmatmul.mubr.f32.vlgmr.msra.gmra.mxu1 %v2321_v9  ;;  %v2314_v10 = vmul.f32 %v3005_v37, %v2306_v30 }
 0xcd1   : > { %2437 = vmatprep.mubr.f32.mxu1 %v3539_v58  ;;  %v2580_v58 = vld [vmem:[%s3872_s18 + $0xe0] sm:$0xff] }
 0xcd2   : > { %v2322_v7 = vadd.f32 %v3006_v55, %v2314_v10  ;;  %3091 = vmatprep.subr.mxu0 %v2580_v58 }
 0xcd3   : > { %3092 = vmatpush3.msra.mxu0 %v2564_v26 }
 0xcd4   : > { %2438 = vmatmul.mubr.f32.gmra.mxu1 %v2322_v7  ;;  %3093 = vmatprep.subr.mxu0 %v2579_v2 }
 0xcd5   : > { %3094 = vmatpush3.msra.mxu0 %v2563_v3 }
 0xcd6   : > { %3095 = vmatprep.subr.mxu0 %v2578_v5 }
 0xcd7   : > { %3096 = vmatpush3.msra.mxu0 %v2562_v61 }
 0xcd8   : > { %3097 = vmatprep.subr.mxu0 %v2577_v4 }
 0xcd9   : > { %3098 = vmatpush3.msra.mxu0 %v2561_v6 }
 0xcda   : > { %3099 = vmatprep.subr.mxu0 %v2576_v25 }
 0xcdb   : > { %3100 = vmatpush3.msra.mxu0 %v2560_v21 }
 0xcdc   : > { %3101 = vmatprep.subr.mxu0 %v2575_v27 }
 0xcdd   : > { %3102 = vmatpush3.msra.mxu0 %v2559_v29 }
 0xcde   : > { %3103 = vmatprep.subr.mxu0 %v2574_v16 }
 0xcdf   : > { %3104 = vmatpush3.msra.mxu0 %v2558_v17 }
 0xce0   : > { %3105 = vmatprep.subr.mxu0 %v2573_v18 }
 0xce1   : > { %3106 = vmatpush3.msra.mxu0 %v2557_v20 }
 0xce2   : > { %3107 = vmatprep.subr.mxu0 %v2572_v22 }
 0xce3   : > { %3108 = vmatpush3.msra.mxu0 %v2556_v23 }
 0xce4   : > { %3109 = vmatprep.subr.mxu0 %v2571_v24 }
 0xce5   : > { %3110 = vmatpush3.msra.mxu0 %v2555_v13 }
 0xce6   : > { %3111 = vmatprep.subr.mxu0 %v2570_v32 }
 0xce7   : > { %3112 = vmatpush3.msra.mxu0 %v2554_v11 }
 0xce8   : > { %3113 = vmatprep.subr.mxu0 %v2569_v12 }
 0xce9   : > { %3114 = vmatpush3.msra.mxu0 %v2553_v33 }
 0xcea   : > { %3115 = vmatprep.subr.mxu0 %v2568_v34 }
 0xceb   : > { %3116 = vmatpush3.msra.mxu0 %v2552_v36 }
 0xd90   : > { %v2433_v42 = vpop.f32.mrf.mxu1 }
 0xd91   : > { %v4377_v43 = vadd.f32 %v2433_v42, %v2360_v40 }
 0xd92   : > { %v2435_v44 = vpop.f32.mrf.mxu1 }
 0xd93   : > { %v4380_v45 = vmul.f32 0.70710677, %v4377_v43  ;;  %v4382_v47 = vadd.f32 %v2435_v44, %v2364_v41 }
 0xd94   : > { %v2439_v48 = vpop.f32.mrf.mxu1 }
 0xd95   : > { %v2460_v49 = vand.u32 2147483647, %v4380_v45  ;;  %v4386_v50 = vmul.f32 0.70710677, %v4382_v47  ;;  %v4388_v51 = vadd.f32 %v2439_v48, %v2360_v40  ;;  %vm2452_vm4 = vcmp.ge.f32.partialorder %v4380_v45, 0.0 }
 0xd96   : > { %v2441_v19 = vpop.f32.mrf.mxu1 }
 0xd97   : > { %v2464_v14 = vmul.f32 0.3275911, %v2460_v49  ;;  %v2461_v15 = vand.u32 2147483647, %v4386_v50  ;;  %v4392_v39 = vmul.f32 0.70710677, %v4388_v51  ;;  %v4394_v46 = vadd.f32 %v2441_v19, %v2364_v41 }
 0xd98   : > { %v2516_v9 = vsub.f32 0.0, %v2460_v49  ;;  %vm2453_vm5 = vcmp.ge.f32.partialorder %v4386_v50, 0.0  ;;  %v2445_v50 = vmul.f32 0.5, %v4382_v47 }
 0xd99   : > { %v2468_v52 = vadd.f32 1.0, %v2464_v14  ;;  %v2465_v35 = vmul.f32 0.3275911, %v2461_v15  ;;  %v2462_v53 = vand.u32 2147483647, %v4392_v39  ;;  %v2517_v10 = vsub.f32 0.0, %v2461_v15 }
 0xd9a   : > { %v4398_v28 = vmul.f32 0.70710677, %v4394_v46  ;;  %v2520_v7 = vmul.f32 %v2516_v9, %v2460_v49  ;;  %v3547_v9 = vmov -1.0   ;;  %vm2454_vm6 = vcmp.ge.f32.partialorder %v4392_v39, 0.0 }
 0xd9b   : > { %3384 = vrcp.f32 %v2468_v52  ;;  %v2469_v37 = vadd.f32 1.0, %v2465_v35  ;;  %v2466_v54 = vmul.f32 0.3275911, %v2462_v53  ;;  %v2518_v57 = vsub.f32 0.0, %v2462_v53 }
 0xd9c   : > { %v2463_v55 = vand.u32 2147483647, %v4398_v28  ;;  %v2521_v62 = vmul.f32 %v2517_v10, %v2461_v15  ;;  %v2524_v0 = vmul.f32 1.442695, %v2520_v7  ;;  %vm2455_vm7 = vcmp.ge.f32.partialorder %v4398_v28, 0.0 }
 0xd9d   : > { %3386 = vrcp.f32 %v2469_v37  ;;  %v2470_v56 = vadd.f32 1.0, %v2466_v54  ;;  %v2522_v58 = vmul.f32 %v2518_v57, %v2462_v53  ;;  %v2459_v39 = vsel %vm2455_vm7, 1.0, %v3547_v9 }
 0xd9e   : > { %v2467_v8 = vmul.f32 0.3275911, %v2463_v55  ;;  %v2519_v1 = vsub.f32 0.0, %v2463_v55  ;;  %v2526_v3 = vmul.f32 1.442695, %v2521_v62  ;;  %v2446_v28 = vmul.f32 0.5, %v4388_v51 }
 0xd9f   : > { %3388 = vrcp.f32 %v2470_v56  ;;  %v2528_v25 = vmul.f32 1.442695, %v2522_v58 }
 0xda0   : > { %v2471_v30 = vadd.f32 1.0, %v2467_v8  ;;  %v2523_v6 = vmul.f32 %v2519_v1, %v2463_v55 }
 0xda2   : > { %3390 = vrcp.f32 %v2471_v30  ;;  %v2530_v22 = vmul.f32 1.442695, %v2523_v6  ;;  %v2456_v30 = vsel %vm2452_vm4, 1.0, %v3547_v9 }
 0xda3   : > { %3392 = vpow2.f32 %v2524_v0  ;;  %v2457_v0 = vsel %vm2453_vm5, 1.0, %v3547_v9 }
 0xda4   : > { %3394 = vpow2.f32 %v2526_v3 }
 0xda5   : > { %3396 = vpow2.f32 %v2528_v25  ;;  %v2444_v25 = vmul.f32 0.5, %v4377_v43  ;;  %v3007_v43 = vld [vmem:[%s822_s22] ss:$0 sm:$0xff]  ;;  %s4512_s22 = sld [smem:[#allocation24_spill]] (!%p3008_p5) }
 0xda6   : > { %3398 = vpow2.f32 %v2530_v22 }
 0xda8   : > { %v3385_v59 = vpop.eup %3384 }
 0xda9   : > { %v2480_v63 = vmul.f32 1.0614054, %v3385_v59 }
 0xdaa   : > { %v3387_v26 = vpop.eup %3386 }
 0xdab   : > { %v2484_v2 = vadd.f32 -1.4531521, %v2480_v63  ;;  %v2481_v5 = vmul.f32 1.0614054, %v3387_v26 }
 0xdac   : > { %v3389_v61 = vpop.eup %3388 }
 0xdad   : > { %v2488_v4 = vmul.f32 %v3385_v59, %v2484_v2  ;;  %v2485_v21 = vadd.f32 -1.4531521, %v2481_v5  ;;  %v2482_v27 = vmul.f32 1.0614054, %v3389_v61  ;;  %v2458_v5 = vsel %vm2454_vm6, 1.0, %v3547_v9 }
 0xdaf   : > { %v2492_v29 = vadd.f32 1.4214138, %v2488_v4  ;;  %v3391_v16 = vpop.eup %3390  ;;  %v2489_v17 = vmul.f32 %v3387_v26, %v2485_v21  ;;  %v2486_v18 = vadd.f32 -1.4531521, %v2482_v27 }
 0xdb0   : > { %v2483_v23 = vmul.f32 1.0614054, %v3391_v16  ;;  %v3393_v14 = vpop.eup %3392 }
 0xdb1   : > { %v2496_v20 = vmul.f32 %v3385_v59, %v2492_v29  ;;  %v2493_v24 = vadd.f32 1.4214138, %v2489_v17  ;;  %v2490_v13 = vmul.f32 %v3389_v61, %v2486_v18  ;;  %v3395_v55 = vpop.eup %3394  ;;  %v2447_v18 = vmul.f32 0.5, %v4394_v46 }
 0xdb2   : > { %v2487_v11 = vadd.f32 -1.4531521, %v2483_v23  ;;  %v3397_v57 = vpop.eup %3396 }
 0xdb3   : > { %v2500_v32 = vadd.f32 -0.28449672, %v2496_v20  ;;  %v2497_v12 = vmul.f32 %v3387_v26, %v2493_v24  ;;  %v2494_v33 = vadd.f32 1.4214138, %v2490_v13  ;;  %v3399_v58 = vpop.eup %3398 }
 0xdb4   : > { %v2491_v36 = vmul.f32 %v3391_v16, %v2487_v11 }
 0xdb5   : > { %v2504_v34 = vmul.f32 %v3385_v59, %v2500_v32  ;;  %v2501_v38 = vadd.f32 -0.28449672, %v2497_v12  ;;  %v2498_v40 = vmul.f32 %v3389_v61, %v2494_v33 }
 0xdb6   : > { %v2495_v42 = vadd.f32 1.4214138, %v2491_v36 }
 0xdb7   : > { %v2508_v41 = vadd.f32 0.2548296, %v2504_v34  ;;  %v2505_v44 = vmul.f32 %v3387_v26, %v2501_v38  ;;  %v2502_v48 = vadd.f32 -0.28449672, %v2498_v40 }
 0xdb8   : > { %v2499_v19 = vmul.f32 %v3391_v16, %v2495_v42 }
 0xdb9   : > { %v2512_v49 = vmul.f32 %v3385_v59, %v2508_v41  ;;  %v2509_v15 = vadd.f32 0.2548296, %v2505_v44  ;;  %v2506_v52 = vmul.f32 %v3389_v61, %v2502_v48 }
 0xdba   : > { %v2503_v53 = vadd.f32 -0.28449672, %v2499_v19 }
 0xdbb   : > { %v2532_v35 = vmul.f32 %v3393_v14, %v2512_v49  ;;  %v2513_v37 = vmul.f32 %v3387_v26, %v2509_v15  ;;  %v2510_v54 = vadd.f32 0.2548296, %v2506_v52 }
 0xdbc   : > { %v2507_v8 = vmul.f32 %v3391_v16, %v2503_v53 }
 0xdbd   : > { %v2536_v56 = vsub.f32 1.0, %v2532_v35  ;;  %v2533_v10 = vmul.f32 %v3395_v55, %v2513_v37  ;;  %v2514_v7 = vmul.f32 %v3389_v61, %v2510_v54 }
 0xdbe   : > { %v2511_v62 = vadd.f32 0.2548296, %v2507_v8 }
 0xdbf   : > { %v2540_v59 = vmul.f32 %v2536_v56, %v2456_v30  ;;  %v2537_v63 = vsub.f32 1.0, %v2533_v10  ;;  %v2534_v45 = vmul.f32 %v3397_v57, %v2514_v7 }
 0xdc0   : > { %v2515_v1 = vmul.f32 %v3391_v16, %v2511_v62 }
 0xdc1   : > { %v2541_v26 = vmul.f32 %v2537_v63, %v2457_v0  ;;  %v2538_v2 = vsub.f32 1.0, %v2534_v45  ;;  %v2544_v3 = vadd.f32 1.0, %v2540_v59 }
 0xdc2   : > { %v2535_v4 = vmul.f32 %v3399_v58, %v2515_v1 }
 0xdc3   : > { %v2545_v61 = vadd.f32 1.0, %v2541_v26  ;;  %v2542_v6 = vmul.f32 %v2538_v2, %v2458_v5  ;;  %v2548_v29 = vmul.f32 %v2544_v3, %v2444_v25 }
 0xdc4   : > { %v2539_v21 = vsub.f32 1.0, %v2535_v4 }
 0xdc5   : > { %v2549_v27 = vmul.f32 %v2545_v61, %v2445_v50  ;;  %v2546_v17 = vadd.f32 1.0, %v2542_v6 }
 0xdc6   : > { %v2543_v16 = vmul.f32 %v2539_v21, %v2459_v39 }
 0xdc7   : > { %2655 = vmatprep.mubr.f32.mxu0 %v2549_v27  ;;  %v2550_v47 = vmul.f32 %v2546_v17, %v2446_v28 }
 0xdc8   : > { %2656 = vmatmul.mubr.f32.vlgmr.msra.gmra.mxu0 %v2548_v29  ;;  %v2547_v20 = vadd.f32 1.0, %v2543_v16 }
 0xdca   : > { %v2551_v22 = vmul.f32 %v2547_v20, %v2447_v18 }
 0xdcc   : > { %2660 = vmatprep.mubr.f32.mxu0 %v2551_v22 }
 0xdcd   : > { %2661 = vmatmul.mubr.f32.gmra.mxu0 %v2550_v47 }
 0xe88   : > { %v3117_v23 = vpop.f32.mrf.mxu0 }
 0xe8a   : > { %v3118_v24 = vpop.f32.mrf.mxu0 }
 0xe8b   : > { %v3119_v13 = vadd.f32 %v3118_v24, %v3117_v23 }
 0xe8d   : > { %v2658_v32 = vadd.f32 %v3119_v13, %v3007_v43  ;;  %v3120_v11 = vpop.f32.mrf.mxu0 }
 0xe8f   : > { %v2666_v46 = vadd.f32 %v2658_v32, %v4281_v60  ;;  %v3121_v12 = vpop.f32.mrf.mxu0 }
 0xe90   : > { %v3122_v33 = vadd.f32 %v3121_v12, %v3120_v11 }
 0xe91   : > { %2668 = vst [vmem:[#allocation2] sm:$0xff] %v2666_v46 }
 0xe92   : > { %v2663_v51 = vadd.f32 %v3122_v33, %v3007_v43  ;;  %2673 = sbr.rel (%p3008_p5) target bundleno = 4241 (0x1091), region = 116 }
 0xe94   : > { %v2667_v34 = vadd.f32 %v2663_v51, %v4279_v31 }
 0xe96   : > { %2669 = vst [vmem:[#allocation2 + $0x8] sm:$0xff] %v2667_v34 }
 0xe97   : > { %2678 = vadd.xlane.f32.xlu0 %v2667_v34  ;;  %v3548_v49 = vmov 0.0   ;;  %vm3549_vm8 = vmmov 0   ;;  %v3009_v37 = vld [vmem:[%s4512_s22] ss:$0 sm:$0xff] }
 0xe98   : > { %3252 = vmatprep.subr.mxu0 %v3548_v49  ;;  %3256 = vmatprep.mubr.msk.f32.mxu0 %vm3549_vm8, %v3548_v49  ;;  %v3010_v55 = vld [vmem:[%s4513_s28] ss:$0 sm:$0xff] }
 0xe99   : > { %v2714_v57 = vld [vmem:[%s4514_s4] sm:$0x3] }
 0xe9b   : > { %2676 = vadd.xlane.f32.xlu0 %v2666_v46 }
 0xf20   : > { %v2679_v36 = vpop.xlane.xlu0 %2678 }
 0xf21   : > { %v2681_v38 = vmul.f32 0.0078125, %v2679_v36 }
 0xf23   : > { %v2683_v40 = vsub.f32 %v2667_v34, %v2681_v38 }
 0xf24   : > { %v2677_v41 = vpop.xlane.xlu0 %2676 }
 0xf25   : > { %v2680_v42 = vmul.f32 0.0078125, %v2677_v41  ;;  %v2685_v44 = vmul.f32 %v2683_v40, %v2683_v40 }
 0xf27   : > { %v2682_v48 = vsub.f32 %v2666_v46, %v2680_v42  ;;  %2688 = vadd.xlane.f32.xlu1 %v2685_v44 }
 0xf29   : > { %v2684_v60 = vmul.f32 %v2682_v48, %v2682_v48 }
 0xf2b   : > { %2686 = vadd.xlane.f32.xlu1 %v2684_v60 }
 0xfb0   : > { %v2689_v31 = vpop.xlane.xlu1 %2688 }
 0xfb1   : > { %v2691_v19 = vmul.f32 0.0078125, %v2689_v31 }
 0xfb3   : > { %v2693_v14 = vadd.f32 1e-05, %v2691_v19 }
 0xfb4   : > { %v2687_v15 = vpop.xlane.xlu1 %2686 }
 0xfb5   : > { %3402 = vrsqrt.f32 %v2693_v14  ;;  %v2690_v52 = vmul.f32 0.0078125, %v2687_v15 }
 0xfb7   : > { %v2692_v35 = vadd.f32 1e-05, %v2690_v52 }
 0xfb9   : > { %3404 = vrsqrt.f32 %v2692_v35 }
 0xfc2   : > { %v3403_v53 = vpop.eup %3402 }
 0xfc3   : > { %v2697_v54 = vmul.f32 %v3403_v53, %v2683_v40 }
 0xfc5   : > { %v2705_v56 = vmul.f32 %v3009_v37, %v2697_v54 }
 0xfc6   : > { %v3405_v8 = vpop.eup %3404 }
 0xfc7   : > { %v2696_v9 = vmul.f32 %v3405_v8, %v2682_v48  ;;  %v2713_v30 = vadd.f32 %v3010_v55, %v2705_v56 }
 0xfc9   : > { %v2704_v10 = vmul.f32 %v3009_v37, %v2696_v9  ;;  %3253 = vmatpush3.msra.mxu0 %v2713_v30 }
 0xfca   : > { %3254 = vmatprep.subr.mxu0 %v3548_v49 }
 0xfcb   : > { %v2712_v7 = vadd.f32 %v3010_v55, %v2704_v10 }
 0xfcd   : > { %3255 = vmatpush3.msra.mxu0 %v2712_v7 }
 0xfce   : > { %3257 = vmatmul.mubr.msk.f32.vlgmr.msra.gmra.mxu0 %vm1117_vm0, %v2714_v57 }
0x108e   : > { %v2784_v59 = vpop.f32.mrf.mxu0 }
0x108f   : > { %2788 = vst [vmem:[%s4515_s0] sm:$0x3] %v2784_v59 }
0x1090   : > { %v3258_v62 = vpop.f32.mrf.mxu0 }
0x1091 PF: > { %s4516_s21 = sld [smem:[#allocation11_spill]]  ;;  %s4519_s0 = smov %s3520_s30 }
0x1092   : > { %s4517_s24 = sld [smem:[#allocation10_spill]] }
0x1093   : > { %s4518_s20 = sld [smem:[#allocation12_spill]] }
0x1097   : > { %p32_p6 = scmp.ge.s32.totalorder %s4516_s21, 4  }
0x1098   : > { %s4520_s30 = smov %s4517_s24 }
0x1099   :  { %34 = sbr.rel (!%p32_p6) target bundleno = 20 (0x14), region = 191 }
0x109e   :  { %2800 = vsyncpa [#allocation4], 1 }
0x109f   :  { %2802 = vsyncpa [#allocation4 + $0x1], 1 }
0x10a0   :  { %2803 = vsyncpa [#allocation6], 1 }
0x10a1   :  { %2805 = vsyncpa [#allocation6 + $0x1], 1 }

</bundles_post_ra>
